<compile_context>
chip_gen: v5e
topology: v5e:2x2
jax: 0.10.0
libtpu: 0.0.40
codegen_flags: <defaults>
</compile_context>

<pallas_src>
import functools

import jax
import jax.numpy as jnp
from jax.experimental import pallas as pl
from jax.experimental.pallas import tpu as pltpu

SUBLANE = 8


def _round_up(x, m):
    return ((x + m - 1) // m) * m


def _siren_kernel(x_ref,
                  w1, b1, w2, b2, w3, b3, w4, b4,
                  w5, b5, w6, b6, w7, b7, w8, b8,
                  out_ref, lat_ref):
    """All 8 layers for one batch tile. w0 is already folded into w1..w7/b1..b7."""
    h = x_ref[...]

    def layer(h, w_ref, b_ref, act=True):
        y = jnp.dot(h, w_ref[...], preferred_element_type=jnp.float32)
        y = y + b_ref[...]                      # b is [1, out] -> broadcasts over rows
        return jnp.sin(y) if act else y

    h = layer(h, w1, b1)
    h = layer(h, w2, b2)
    h = layer(h, w3, b3)
    lat = layer(h, w4, b4)                      # [bm, 4] natural-width latent
    lat_ref[...] = lat.astype(lat_ref.dtype)
    h = layer(lat, w5, b5)                      # K = 4 contraction (no zero padding)
    h = layer(h, w6, b6)
    h = layer(h, w7, b7)
    y = layer(h, w8, b8, act=False)             # last layer: no sin
    out_ref[...] = y.astype(out_ref.dtype)


def refine_swing_stick_nonmagnetic(x, params, *, w0=30.0, bm=1024):
    """x: [B, in_channels] f32. params: 8 tuples (W[in_f, out_f], b[out_f]) — W is
    the transpose of PyTorch's [out, in] layout. Returns (out [B, in_ch], latent [B, 4])."""
    B, in_ch = x.shape
    lat_ch = params[3][0].shape[1]   # 4
    out_ch = params[7][0].shape[1]   # in_channels

    # Fold w0 into the 7 sin layers: sin(w0*(h@W + b)) == sin(h@(w0*W) + w0*b).
    flat = []
    for idx, (w, b) in enumerate(params):
        if idx < 7:
            w = w * w0
            b = b * w0
        flat += [w, b.reshape(1, -1)]

    # Batch tiling: >= 2 grid steps whenever B > 8 (keeps both v7x TCs busy),
    # bm-row tiles for large batches. Batch is zero-padded; rows sliced off after.
    half = -(-B // 2)
    bm_eff = max(SUBLANE, min(bm, _round_up(half, SUBLANE)))
    b_pad = _round_up(B, bm_eff)
    x_p = x if b_pad == B else jnp.pad(x, ((0, b_pad - B), (0, 0)))

    grid = (b_pad // bm_eff,)

    # Natural-width blocks: last dim == full array dim satisfies the (8,128) rule.
    x_spec = pl.BlockSpec((bm_eff, in_ch), lambda i: (i, 0))
    out_spec = pl.BlockSpec((bm_eff, out_ch), lambda i: (i, 0))
    lat_spec = pl.BlockSpec((bm_eff, lat_ch), lambda i: (i, 0))
    # Grid-invariant params: whole array resident in VMEM, not pipelined per step.
    param_specs = [pl.BlockSpec(memory_space=pltpu.MemorySpace.VMEM)] * len(flat)

    dims = [in_ch, 128, 64, 32, lat_ch, 32, 64, 128, out_ch]
    flops = 2 * B * sum(dims[i] * dims[i + 1] for i in range(8))
    transcendentals = B * sum(dims[1:8])
    bytes_accessed = 4 * (B * (in_ch + out_ch + lat_ch)
                          + sum(dims[i] * dims[i + 1] + dims[i + 1] for i in range(8)))

    out_p, lat_p = pl.pallas_call(
        _siren_kernel,
        out_shape=(jax.ShapeDtypeStruct((b_pad, out_ch), x.dtype),
                   jax.ShapeDtypeStruct((b_pad, lat_ch), x.dtype)),
        grid_spec=pltpu.PrefetchScalarGridSpec(
            num_scalar_prefetch=0,
            grid=grid,
            in_specs=[x_spec] + param_specs,
            out_specs=[out_spec, lat_spec],
        ),
        compiler_params=pltpu.CompilerParams(
            dimension_semantics=("parallel",),
            vmem_limit_bytes=32 * 1024 * 1024,
        ),
        cost_estimate=pl.CostEstimate(
            flops=flops,
            transcendentals=transcendentals,
            bytes_accessed=bytes_accessed,
        ),
    )(x_p, *flat)

    return out_p[:B], lat_p[:B]


def init_params(key, in_channels, w0=30.0):
    """Deterministic SIREN-style init matching the PyTorch module's layer shapes."""
    dims = [in_channels, 128, 64, 32, 4, 32, 64, 128, in_channels]
    params = []
    for i in range(8):
        fan_in, fan_out = dims[i], dims[i + 1]
        key, kw, kb = jax.random.split(key, 3)
        w_bound = (1.0 / fan_in) if i == 0 else (6.0 / fan_in) ** 0.5 / w0
        b_bound = 1.0 / (fan_in ** 0.5)   # PyTorch default nn.Linear bias init
        # stored as [in, out] (kernel-friendly transpose of PyTorch layout)
        w = jax.random.uniform(kw, (fan_in, fan_out), jnp.float32, -w_bound, w_bound)
        b = jax.random.uniform(kb, (fan_out,), jnp.float32, -b_bound, b_bound)
        params.append((w, b))
    return params


def refine_ref(x, params, w0=30.0):
    """Pure-JAX reference (high-precision matmuls to match f32 MXU accumulation)."""
    h = x
    latent = None
    for i, (w, b) in enumerate(params):
        h = jnp.dot(h, w, precision=jax.lax.Precision.HIGHEST) + b
        if i < 7:
            h = jnp.sin(w0 * h)
        if i == 3:
            latent = h
    return h, latent


if __name__ == "__main__":
    key = jax.random.PRNGKey(0)
    in_channels = 4

    kx, kp = jax.random.split(key)
    params = init_params(kp, in_channels)

    # Small batch: exercises the 2-step small-batch path.
    x_small = jax.random.normal(kx, (16, in_channels), jnp.float32)
    out_s, lat_s = refine_swing_stick_nonmagnetic(x_small, params)
    out_s = jax.block_until_ready(out_s)
    lat_s = jax.block_until_ready(lat_s)
    ref_out_s, ref_lat_s = refine_ref(x_small, params)
    assert out_s.shape == (16, in_channels) and lat_s.shape == (16, 4)
    assert jnp.allclose(out_s, ref_out_s, atol=1e-3, rtol=1e-3), "out mismatch (small)"
    assert jnp.allclose(lat_s, ref_lat_s, atol=1e-3, rtol=1e-3), "latent mismatch (small)"

    # Odd-sized larger batch: exercises batch padding + multi-tile grid.
    x_big = jax.random.normal(kx, (517, in_channels), jnp.float32)
    out_b, lat_b = refine_swing_stick_nonmagnetic(x_big, params, bm=1024)
    out_b = jax.block_until_ready(out_b)
    lat_b = jax.block_until_ready(lat_b)
    ref_out_b, ref_lat_b = refine_ref(x_big, params)
    assert out_b.shape == (517, in_channels) and lat_b.shape == (517, 4)
    assert jnp.allclose(out_b, ref_out_b, atol=1e-3, rtol=1e-3), "out mismatch (big)"
    assert jnp.allclose(lat_b, ref_lat_b, atol=1e-3, rtol=1e-3), "latent mismatch (big)"

    print("KERNEL_OK")
</pallas_src>

<mosaic_0001>
module attributes {stable_mosaic.version = 11 : i64} {
  func.func @_siren_kernel(%arg0: i32, %arg1: memref<8x4xf32, #tpu.memory_space<vmem>>, %arg2: memref<4x128xf32, #tpu.memory_space<vmem>>, %arg3: memref<1x128xf32, #tpu.memory_space<vmem>>, %arg4: memref<128x64xf32, #tpu.memory_space<vmem>>, %arg5: memref<1x64xf32, #tpu.memory_space<vmem>>, %arg6: memref<64x32xf32, #tpu.memory_space<vmem>>, %arg7: memref<1x32xf32, #tpu.memory_space<vmem>>, %arg8: memref<32x4xf32, #tpu.memory_space<vmem>>, %arg9: memref<1x4xf32, #tpu.memory_space<vmem>>, %arg10: memref<4x32xf32, #tpu.memory_space<vmem>>, %arg11: memref<1x32xf32, #tpu.memory_space<vmem>>, %arg12: memref<32x64xf32, #tpu.memory_space<vmem>>, %arg13: memref<1x64xf32, #tpu.memory_space<vmem>>, %arg14: memref<64x128xf32, #tpu.memory_space<vmem>>, %arg15: memref<1x128xf32, #tpu.memory_space<vmem>>, %arg16: memref<128x4xf32, #tpu.memory_space<vmem>>, %arg17: memref<1x4xf32, #tpu.memory_space<vmem>>, %arg18: memref<8x4xf32, #tpu.memory_space<vmem>>, %arg19: memref<8x4xf32, #tpu.memory_space<vmem>>) attributes {dimension_semantics = [#tpu.dimension_semantics<parallel>], iteration_bounds = array<i64: 2>, scalar_prefetch = 0 : i64, scratch_operands = 0 : i64, tpu.core_type = #tpu.core_type<tc>, window_params = [{transform_indices = @transform_0, window_bounds = array<i64: 8, 4>}, {pipeline_mode = #tpu.pipeline_mode<synchronous>, transform_indices = @transform_1, window_bounds = array<i64: 4, 128>}, {pipeline_mode = #tpu.pipeline_mode<synchronous>, transform_indices = @transform_2, window_bounds = array<i64: 1, 128>}, {pipeline_mode = #tpu.pipeline_mode<synchronous>, transform_indices = @transform_3, window_bounds = array<i64: 128, 64>}, {pipeline_mode = #tpu.pipeline_mode<synchronous>, transform_indices = @transform_4, window_bounds = array<i64: 1, 64>}, {pipeline_mode = #tpu.pipeline_mode<synchronous>, transform_indices = @transform_5, window_bounds = array<i64: 64, 32>}, {pipeline_mode = #tpu.pipeline_mode<synchronous>, transform_indices = @transform_6, window_bounds = array<i64: 1, 32>}, {pipeline_mode = #tpu.pipeline_mode<synchronous>, transform_indices = @transform_7, window_bounds = array<i64: 32, 4>}, {pipeline_mode = #tpu.pipeline_mode<synchronous>, transform_indices = @transform_8, window_bounds = array<i64: 1, 4>}, {pipeline_mode = #tpu.pipeline_mode<synchronous>, transform_indices = @transform_9, window_bounds = array<i64: 4, 32>}, {pipeline_mode = #tpu.pipeline_mode<synchronous>, transform_indices = @transform_10, window_bounds = array<i64: 1, 32>}, {pipeline_mode = #tpu.pipeline_mode<synchronous>, transform_indices = @transform_11, window_bounds = array<i64: 32, 64>}, {pipeline_mode = #tpu.pipeline_mode<synchronous>, transform_indices = @transform_12, window_bounds = array<i64: 1, 64>}, {pipeline_mode = #tpu.pipeline_mode<synchronous>, transform_indices = @transform_13, window_bounds = array<i64: 64, 128>}, {pipeline_mode = #tpu.pipeline_mode<synchronous>, transform_indices = @transform_14, window_bounds = array<i64: 1, 128>}, {pipeline_mode = #tpu.pipeline_mode<synchronous>, transform_indices = @transform_15, window_bounds = array<i64: 128, 4>}, {pipeline_mode = #tpu.pipeline_mode<synchronous>, transform_indices = @transform_16, window_bounds = array<i64: 1, 4>}, {transform_indices = @transform_17, window_bounds = array<i64: 8, 4>}, {transform_indices = @transform_18, window_bounds = array<i64: 8, 4>}]} {
    %c0 = arith.constant 0 : index
    %c0_0 = arith.constant 0 : index
    %0 = vector.load %arg1[%c0, %c0_0] : memref<8x4xf32, #tpu.memory_space<vmem>>, vector<8x4xf32>
    %c0_1 = arith.constant 0 : index
    %c0_2 = arith.constant 0 : index
    %1 = vector.load %arg2[%c0_1, %c0_2] : memref<4x128xf32, #tpu.memory_space<vmem>>, vector<4x128xf32>
    %cst = arith.constant dense<0.000000e+00> : vector<8x128xf32>
    %2 = tpu.matmul %0, %1, %cst {dimension_numbers = #tpu.dot_dimension_numbers<[1], [0], [0], [1], [0, 0, 1, 1], [], []>} : vector<8x4xf32>, vector<4x128xf32>, vector<8x128xf32> -> vector<8x128xf32>
    %c0_3 = arith.constant 0 : index
    %c0_4 = arith.constant 0 : index
    %3 = vector.load %arg3[%c0_3, %c0_4] : memref<1x128xf32, #tpu.memory_space<vmem>>, vector<1x128xf32>
    %4 = vector.broadcast %3 : vector<1x128xf32> to vector<8x128xf32>
    %5 = arith.addf %2, %4 : vector<8x128xf32>
    %6 = math.sin %5 : vector<8x128xf32>
    %c0_5 = arith.constant 0 : index
    %c0_6 = arith.constant 0 : index
    %7 = vector.load %arg4[%c0_5, %c0_6] : memref<128x64xf32, #tpu.memory_space<vmem>>, vector<128x64xf32>
    %cst_7 = arith.constant dense<0.000000e+00> : vector<8x64xf32>
    %8 = tpu.matmul %6, %7, %cst_7 {dimension_numbers = #tpu.dot_dimension_numbers<[1], [0], [0], [1], [0, 0, 1, 1], [], []>} : vector<8x128xf32>, vector<128x64xf32>, vector<8x64xf32> -> vector<8x64xf32>
    %c0_8 = arith.constant 0 : index
    %c0_9 = arith.constant 0 : index
    %9 = vector.load %arg5[%c0_8, %c0_9] : memref<1x64xf32, #tpu.memory_space<vmem>>, vector<1x64xf32>
    %10 = vector.broadcast %9 : vector<1x64xf32> to vector<8x64xf32>
    %11 = arith.addf %8, %10 : vector<8x64xf32>
    %12 = math.sin %11 : vector<8x64xf32>
    %c0_10 = arith.constant 0 : index
    %c0_11 = arith.constant 0 : index
    %13 = vector.load %arg6[%c0_10, %c0_11] : memref<64x32xf32, #tpu.memory_space<vmem>>, vector<64x32xf32>
    %cst_12 = arith.constant dense<0.000000e+00> : vector<8x32xf32>
    %14 = tpu.matmul %12, %13, %cst_12 {dimension_numbers = #tpu.dot_dimension_numbers<[1], [0], [0], [1], [0, 0, 1, 1], [], []>} : vector<8x64xf32>, vector<64x32xf32>, vector<8x32xf32> -> vector<8x32xf32>
    %c0_13 = arith.constant 0 : index
    %c0_14 = arith.constant 0 : index
    %15 = vector.load %arg7[%c0_13, %c0_14] : memref<1x32xf32, #tpu.memory_space<vmem>>, vector<1x32xf32>
    %16 = vector.broadcast %15 : vector<1x32xf32> to vector<8x32xf32>
    %17 = arith.addf %14, %16 : vector<8x32xf32>
    %18 = math.sin %17 : vector<8x32xf32>
    %c0_15 = arith.constant 0 : index
    %c0_16 = arith.constant 0 : index
    %19 = vector.load %arg8[%c0_15, %c0_16] : memref<32x4xf32, #tpu.memory_space<vmem>>, vector<32x4xf32>
    %cst_17 = arith.constant dense<0.000000e+00> : vector<8x4xf32>
    %20 = tpu.matmul %18, %19, %cst_17 {dimension_numbers = #tpu.dot_dimension_numbers<[1], [0], [0], [1], [0, 0, 1, 1], [], []>} : vector<8x32xf32>, vector<32x4xf32>, vector<8x4xf32> -> vector<8x4xf32>
    %c0_18 = arith.constant 0 : index
    %c0_19 = arith.constant 0 : index
    %21 = vector.load %arg9[%c0_18, %c0_19] : memref<1x4xf32, #tpu.memory_space<vmem>>, vector<1x4xf32>
    %22 = vector.broadcast %21 : vector<1x4xf32> to vector<8x4xf32>
    %23 = arith.addf %20, %22 : vector<8x4xf32>
    %24 = math.sin %23 : vector<8x4xf32>
    %c0_20 = arith.constant 0 : index
    %c0_21 = arith.constant 0 : index
    %25 = vector.load %arg19[%c0_20, %c0_21] : memref<8x4xf32, #tpu.memory_space<vmem>>, vector<8x4xf32>
    tpu.vector_store %arg19[%c0_20, %c0_21], %24 {strides = array<i32>} : memref<8x4xf32, #tpu.memory_space<vmem>>, vector<8x4xf32>,
    %c0_22 = arith.constant 0 : index
    %c0_23 = arith.constant 0 : index
    %26 = vector.load %arg10[%c0_22, %c0_23] : memref<4x32xf32, #tpu.memory_space<vmem>>, vector<4x32xf32>
    %cst_24 = arith.constant dense<0.000000e+00> : vector<8x32xf32>
    %27 = tpu.matmul %24, %26, %cst_24 {dimension_numbers = #tpu.dot_dimension_numbers<[1], [0], [0], [1], [0, 0, 1, 1], [], []>} : vector<8x4xf32>, vector<4x32xf32>, vector<8x32xf32> -> vector<8x32xf32>
    %c0_25 = arith.constant 0 : index
    %c0_26 = arith.constant 0 : index
    %28 = vector.load %arg11[%c0_25, %c0_26] : memref<1x32xf32, #tpu.memory_space<vmem>>, vector<1x32xf32>
    %29 = vector.broadcast %28 : vector<1x32xf32> to vector<8x32xf32>
    %30 = arith.addf %27, %29 : vector<8x32xf32>
    %31 = math.sin %30 : vector<8x32xf32>
    %c0_27 = arith.constant 0 : index
    %c0_28 = arith.constant 0 : index
    %32 = vector.load %arg12[%c0_27, %c0_28] : memref<32x64xf32, #tpu.memory_space<vmem>>, vector<32x64xf32>
    %cst_29 = arith.constant dense<0.000000e+00> : vector<8x64xf32>
    %33 = tpu.matmul %31, %32, %cst_29 {dimension_numbers = #tpu.dot_dimension_numbers<[1], [0], [0], [1], [0, 0, 1, 1], [], []>} : vector<8x32xf32>, vector<32x64xf32>, vector<8x64xf32> -> vector<8x64xf32>
    %c0_30 = arith.constant 0 : index
    %c0_31 = arith.constant 0 : index
    %34 = vector.load %arg13[%c0_30, %c0_31] : memref<1x64xf32, #tpu.memory_space<vmem>>, vector<1x64xf32>
    %35 = vector.broadcast %34 : vector<1x64xf32> to vector<8x64xf32>
    %36 = arith.addf %33, %35 : vector<8x64xf32>
    %37 = math.sin %36 : vector<8x64xf32>
    %c0_32 = arith.constant 0 : index
    %c0_33 = arith.constant 0 : index
    %38 = vector.load %arg14[%c0_32, %c0_33] : memref<64x128xf32, #tpu.memory_space<vmem>>, vector<64x128xf32>
    %cst_34 = arith.constant dense<0.000000e+00> : vector<8x128xf32>
    %39 = tpu.matmul %37, %38, %cst_34 {dimension_numbers = #tpu.dot_dimension_numbers<[1], [0], [0], [1], [0, 0, 1, 1], [], []>} : vector<8x64xf32>, vector<64x128xf32>, vector<8x128xf32> -> vector<8x128xf32>
    %c0_35 = arith.constant 0 : index
    %c0_36 = arith.constant 0 : index
    %40 = vector.load %arg15[%c0_35, %c0_36] : memref<1x128xf32, #tpu.memory_space<vmem>>, vector<1x128xf32>
    %41 = vector.broadcast %40 : vector<1x128xf32> to vector<8x128xf32>
    %42 = arith.addf %39, %41 : vector<8x128xf32>
    %43 = math.sin %42 : vector<8x128xf32>
    %c0_37 = arith.constant 0 : index
    %c0_38 = arith.constant 0 : index
    %44 = vector.load %arg16[%c0_37, %c0_38] : memref<128x4xf32, #tpu.memory_space<vmem>>, vector<128x4xf32>
    %cst_39 = arith.constant dense<0.000000e+00> : vector<8x4xf32>
    %45 = tpu.matmul %43, %44, %cst_39 {dimension_numbers = #tpu.dot_dimension_numbers<[1], [0], [0], [1], [0, 0, 1, 1], [], []>} : vector<8x128xf32>, vector<128x4xf32>, vector<8x4xf32> -> vector<8x4xf32>
    %c0_40 = arith.constant 0 : index
    %c0_41 = arith.constant 0 : index
    %46 = vector.load %arg17[%c0_40, %c0_41] : memref<1x4xf32, #tpu.memory_space<vmem>>, vector<1x4xf32>
    %47 = vector.broadcast %46 : vector<1x4xf32> to vector<8x4xf32>
    %48 = arith.addf %45, %47 : vector<8x4xf32>
    %c0_42 = arith.constant 0 : index
    %c0_43 = arith.constant 0 : index
    %49 = vector.load %arg18[%c0_42, %c0_43] : memref<8x4xf32, #tpu.memory_space<vmem>>, vector<8x4xf32>
    tpu.vector_store %arg18[%c0_42, %c0_43], %48 {strides = array<i32>} : memref<8x4xf32, #tpu.memory_space<vmem>>, vector<8x4xf32>,
    return
  }
  func.func @transform_0(%arg0: i32) -> (i32, i32) {
    %c0_i32 = arith.constant 0 : i32
    %c0_i32_0 = arith.constant 0 : i32
    return %arg0, %c0_i32 : i32, i32
  }
  func.func @transform_1(%arg0: i32) -> (i32, i32) {
    %c0_i32 = arith.constant 0 : i32
    %c0_i32_0 = arith.constant 0 : i32
    %c0_i32_1 = arith.constant 0 : i32
    return %c0_i32, %c0_i32_0 : i32, i32
  }
  func.func @transform_2(%arg0: i32) -> (i32, i32) {
    %c0_i32 = arith.constant 0 : i32
    %c0_i32_0 = arith.constant 0 : i32
    %c0_i32_1 = arith.constant 0 : i32
    return %c0_i32, %c0_i32_0 : i32, i32
  }
  func.func @transform_3(%arg0: i32) -> (i32, i32) {
    %c0_i32 = arith.constant 0 : i32
    %c0_i32_0 = arith.constant 0 : i32
    %c0_i32_1 = arith.constant 0 : i32
    return %c0_i32, %c0_i32_0 : i32, i32
  }
  func.func @transform_4(%arg0: i32) -> (i32, i32) {
    %c0_i32 = arith.constant 0 : i32
    %c0_i32_0 = arith.constant 0 : i32
    %c0_i32_1 = arith.constant 0 : i32
    return %c0_i32, %c0_i32_0 : i32, i32
  }
  func.func @transform_5(%arg0: i32) -> (i32, i32) {
    %c0_i32 = arith.constant 0 : i32
    %c0_i32_0 = arith.constant 0 : i32
    %c0_i32_1 = arith.constant 0 : i32
    return %c0_i32, %c0_i32_0 : i32, i32
  }
  func.func @transform_6(%arg0: i32) -> (i32, i32) {
    %c0_i32 = arith.constant 0 : i32
    %c0_i32_0 = arith.constant 0 : i32
    %c0_i32_1 = arith.constant 0 : i32
    return %c0_i32, %c0_i32_0 : i32, i32
  }
  func.func @transform_7(%arg0: i32) -> (i32, i32) {
    %c0_i32 = arith.constant 0 : i32
    %c0_i32_0 = arith.constant 0 : i32
    %c0_i32_1 = arith.constant 0 : i32
    return %c0_i32, %c0_i32_0 : i32, i32
  }
  func.func @transform_8(%arg0: i32) -> (i32, i32) {
    %c0_i32 = arith.constant 0 : i32
    %c0_i32_0 = arith.constant 0 : i32
    %c0_i32_1 = arith.constant 0 : i32
    return %c0_i32, %c0_i32_0 : i32, i32
  }
  func.func @transform_9(%arg0: i32) -> (i32, i32) {
    %c0_i32 = arith.constant 0 : i32
    %c0_i32_0 = arith.constant 0 : i32
    %c0_i32_1 = arith.constant 0 : i32
    return %c0_i32, %c0_i32_0 : i32, i32
  }
  func.func @transform_10(%arg0: i32) -> (i32, i32) {
    %c0_i32 = arith.constant 0 : i32
    %c0_i32_0 = arith.constant 0 : i32
    %c0_i32_1 = arith.constant 0 : i32
    return %c0_i32, %c0_i32_0 : i32, i32
  }
  func.func @transform_11(%arg0: i32) -> (i32, i32) {
    %c0_i32 = arith.constant 0 : i32
    %c0_i32_0 = arith.constant 0 : i32
    %c0_i32_1 = arith.constant 0 : i32
    return %c0_i32, %c0_i32_0 : i32, i32
  }
  func.func @transform_12(%arg0: i32) -> (i32, i32) {
    %c0_i32 = arith.constant 0 : i32
    %c0_i32_0 = arith.constant 0 : i32
    %c0_i32_1 = arith.constant 0 : i32
    return %c0_i32, %c0_i32_0 : i32, i32
  }
  func.func @transform_13(%arg0: i32) -> (i32, i32) {
    %c0_i32 = arith.constant 0 : i32
    %c0_i32_0 = arith.constant 0 : i32
    %c0_i32_1 = arith.constant 0 : i32
    return %c0_i32, %c0_i32_0 : i32, i32
  }
  func.func @transform_14(%arg0: i32) -> (i32, i32) {
    %c0_i32 = arith.constant 0 : i32
    %c0_i32_0 = arith.constant 0 : i32
    %c0_i32_1 = arith.constant 0 : i32
    return %c0_i32, %c0_i32_0 : i32, i32
  }
  func.func @transform_15(%arg0: i32) -> (i32, i32) {
    %c0_i32 = arith.constant 0 : i32
    %c0_i32_0 = arith.constant 0 : i32
    %c0_i32_1 = arith.constant 0 : i32
    return %c0_i32, %c0_i32_0 : i32, i32
  }
  func.func @transform_16(%arg0: i32) -> (i32, i32) {
    %c0_i32 = arith.constant 0 : i32
    %c0_i32_0 = arith.constant 0 : i32
    %c0_i32_1 = arith.constant 0 : i32
    return %c0_i32, %c0_i32_0 : i32, i32
  }
  func.func @transform_17(%arg0: i32) -> (i32, i32) {
    %c0_i32 = arith.constant 0 : i32
    %c0_i32_0 = arith.constant 0 : i32
    return %arg0, %c0_i32 : i32, i32
  }
  func.func @transform_18(%arg0: i32) -> (i32, i32) {
    %c0_i32 = arith.constant 0 : i32
    %c0_i32_0 = arith.constant 0 : i32
    return %arg0, %c0_i32 : i32, i32
  }
}

</mosaic_0001>

<bundles_post_ra>
// kernel: tpu_custom_call.1
= control target key start
LH: loop header
LB: loop body
LE: loop exit
PB: predicated region body
PF: predicated region fallthrough
CT: control target
= control target key end

     0   :  { %s2204_s27 = smov 0   ;;  %s2880_s0 = inlined_call_operand.vmem [shape: f32[16,4], index: 0, kind: input, shape index: {}]   ;;  %s2881_s1 = inlined_call_operand.vmem [shape: f32[4,128], index: 1, kind: input, shape index: {}]   ;;  %s2882_s2 = inlined_call_operand.vmem [shape: f32[1,128], index: 2, kind: input, shape index: {}]   ;;  %s2883_s3 = inlined_call_operand.vmem [shape: f32[128,64], index: 3, kind: input, shape index: {}]   ;;  %s2884_s4 = inlined_call_operand.vmem [shape: f32[1,64], index: 4, kind: input, shape index: {}]   ;;  %s2885_s5 = inlined_call_operand.vmem [shape: f32[64,32], index: 5, kind: input, shape index: {}]   ;;  %s2886_s6 = inlined_call_operand.vmem [shape: f32[1,32], index: 6, kind: input, shape index: {}]   ;;  %s2887_s7 = inlined_call_operand.vmem [shape: f32[32,4], index: 7, kind: input, shape index: {}]   ;;  %s2888_s8 = inlined_call_operand.vmem [shape: f32[1,4], index: 8, kind: input, shape index: {}]   ;;  %s2889_s9 = inlined_call_operand.vmem [shape: f32[4,32], index: 9, kind: input, shape index: {}]   ;;  %s2890_s10 = inlined_call_operand.vmem [shape: f32[1,32], index: 10, kind: input, shape index: {}]   ;;  %s2891_s11 = inlined_call_operand.vmem [shape: f32[32,64], index: 11, kind: input, shape index: {}]   ;;  %s2892_s12 = inlined_call_operand.vmem [shape: f32[1,64], index: 12, kind: input, shape index: {}]   ;;  %s2893_s13 = inlined_call_operand.vmem [shape: f32[64,128], index: 13, kind: input, shape index: {}]   ;;  %s2894_s14 = inlined_call_operand.vmem [shape: f32[1,128], index: 14, kind: input, shape index: {}]   ;;  %s2895_s15 = inlined_call_operand.vmem [shape: f32[128,4], index: 15, kind: input, shape index: {}]   ;;  %s2896_s16 = inlined_call_operand.vmem [shape: f32[1,4], index: 16, kind: input, shape index: {}]   ;;  %s2897_s17 = inlined_call_operand.vmem [shape: f32[16,4], index: 17, kind: output, shape index: {0}]   ;;  %s2898_s18 = inlined_call_operand.vmem [shape: f32[16,4], index: 18, kind: output, shape index: {1}]  }
   0x1   :  { %2899 = sst [smem:[#allocation2_spill]] %s2880_s0 }
   0x2   :  { %2900 = sst [smem:[#allocation3_spill]] %s2881_s1 }
   0x3   :  { %2901 = sst [smem:[#allocation4_spill]] %s2882_s2 }
   0x4 LB: > { %s2032_s28 = sadd.s32 4294967295, %s2100_s27   ;;  %p2036_p0 = scmp.ge.s32.totalorder %s2100_s27, 1  ;;  %s2100_s27 = sphi %s2204_s27, %s29_s27  }
   0x5   : > { %p514_p1 = scmp.lt.s32.totalorder %s2100_s27, 3 }
   0x7   : > { %p515_p2 = pnand %p2036_p0, %p514_p1 }
   0x8   : > { %s2902_s0 = sld [smem:[#allocation3_spill]] (!%p515_p2)  ;;  %p570_p3 = scmp.lt.s32.totalorder (!%p515_p2), %s2032_s28, 1 }
   0x9   : > { %518 = sbr.rel (%p515_p2) target bundleno = 1739 (0x6cb), region = 88  ;;  %s2903_s21 = sld [smem:[#allocation2_spill]] (!%p515_p2) }
   0xe   : > { %v583_v0 = vld [vmem:[%s2902_s0] sm:$0xf]  ;;  %vm592_vm0 = vcmask 1043456   ;;  %s2906_s28 = smov (!%p570_p3, %s2032_s28), 1  ;;  %vm588_vm1 = vcmask 31744   ;;  %v786_v2 = vld [vmem:[%s2883_s3 + $0x78] sm:$0xff] }
   0xf   : > { %2040 = vmatpush.msk.msra.mxu0 %vm592_vm0, %v583_v0  ;;  %s2216_s19 = sshll.u32 %s2906_s28, 3  ;;  %v785_v3 = vld [vmem:[%s2883_s3 + $0x70] sm:$0xff]  ;;  %791 = vmatpush.msra.mxu1 %v786_v2  ;;  %v784_v4 = vld [vmem:[%s2883_s3 + $0x68] sm:$0xff]  ;;  %v783_v5 = vld [vmem:[%s2883_s3 + $0x60] sm:$0xff]  ;;  %v2102_v31 = vmov 2102212464  }
  0x10   : > { %s573_s22 = scalar_lea.vmem %s2903_s21, %s2216_s19  ;;  %v782_v6 = vld [vmem:[%s2883_s3 + $0x58] sm:$0xff]  ;;  %v781_v8 = vld [vmem:[%s2883_s3 + $0x50] sm:$0xff]  ;;  %v780_v9 = vld [vmem:[%s2883_s3 + $0x48] sm:$0xff]  ;;  %v2103_v33 = vmov 920167782   ;;  %s581_s26 = scalar_lea.vmem %s2898_s18, %s2216_s19 }
  0x11   : > { %v582_v1 = vld [vmem:[%s573_s22] sm:$0xff]  ;;  %792 = vmatpush.msra.mxu1 %v785_v3  ;;  %s2904_s22 = sld [smem:[#allocation4_spill]]  ;;  %v778_v14 = vld [vmem:[%s2883_s3 + $0x38] sm:$0xff]  ;;  %v777_v16 = vld [vmem:[%s2883_s3 + $0x30] sm:$0xff]  ;;  %v2104_v36 = vmov 1326507024   ;;  %s577_s29 = scalar_lea.vmem %s2897_s17, %s2216_s19 }
  0x12   : > { %2041 = vmatmul.msk.f32.vlgmr.msra.gmra.mxu0 %vm588_vm1, %v582_v1  ;;  %v779_v12 = vld [vmem:[%s2883_s3 + $0x40] sm:$0xff]  ;;  %v776_v18 = vld [vmem:[%s2883_s3 + $0x28] sm:$0xff]  ;;  %v774_v22 = vld [vmem:[%s2883_s3 + $0x18] sm:$0xff]  ;;  %v2105_v39 = vmov 683565275  }
  0x13   : > { %793 = vmatpush.msra.mxu1 %v784_v4  ;;  %v775_v21 = vld [vmem:[%s2883_s3 + $0x20] sm:$0xff]  ;;  %v773_v26 = vld [vmem:[%s2883_s3 + $0x10] sm:$0xff]  ;;  %v772_v28 = vld [vmem:[%s2883_s3 + $0x8] sm:$0xff]  ;;  %v2106_v41 = vmov 2475754826  }
  0x14   : > { %v771_v38 = vld [vmem:[%s2883_s3] sm:$0xff]  ;;  %v2107_v44 = vmov 2131351028  }
  0x15   : > { %794 = vmatpush.msra.mxu1 %v783_v5 }
  0x17   : > { %v2086_v7 = vld [vmem:[%s2904_s22] ss:$0 sm:$0xff]  ;;  %795 = vmatpush.msra.mxu1 %v782_v6 }
  0x19   : > { %796 = vmatpush.msra.mxu1 %v781_v8 }
  0x1b   : > { %797 = vmatpush.msra.mxu1 %v780_v9 }
  0x1d   : > { %798 = vmatpush.msra.mxu1 %v779_v12 }
  0x1f   : > { %799 = vmatpush.msra.mxu1 %v778_v14 }
  0x21   : > { %800 = vmatpush.msra.mxu1 %v777_v16 }
  0x23   : > { %801 = vmatpush.msra.mxu1 %v776_v18 }
  0x25   : > { %802 = vmatpush.msra.mxu1 %v775_v21 }
  0x27   : > { %803 = vmatpush.msra.mxu1 %v774_v22 }
  0x29   : > { %804 = vmatpush.msra.mxu1 %v773_v26 }
  0x2b   : > { %805 = vmatpush.msra.mxu1 %v772_v28 }
  0x2d   : > { %806 = vmatpush.msra.mxu1 %v771_v38 }
  0x8f   : > { %v613_v10 = vpop.f32.mrf.mxu0 }
  0x90   : > { %v2247_v11 = vadd.f32 %v2086_v7, %v613_v10 }
  0x92   : > { %v619_v13 = vand.u32 2139095040, %v2247_v11  ;;  %v616_v19 = vand.u32 2147483647, %v2247_v11  ;;  %vm618_vm14 = vcmp.lt.s32.totalorder %v2247_v11, 0 }
  0x94   : > { %v620_v15 = vshrl.u32 %v619_v13, 23  ;;  %v623_v23 = vand.u32 8388607, %v616_v19  ;;  %vm617_vm15 = vcmp.le.f32.partialorder %v616_v19, 0.7853982 }
  0x96   : > { %v2042_v17 = vadd.s32 4294967169, %v620_v15  ;;  %v624_v29 = vor.u32 8388608, %v623_v23 }
  0x98   : > { %v626_v20 = vadd.s32 1, %v2042_v17  ;;  %v2299_v51 = vshll.u32 %v624_v29, 8 }
  0x9a   : > { %vm627_vm2 = vcmp.gt.s32.totalorder %v626_v20, 0  ;;  %v665_v61 = vand.u32 65535, %v2299_v51  ;;  %v666_v63 = vshrl.u32 %v2299_v51, 16 }
  0x9b   : > { %v628_v24 = vsel %vm627_vm2, %v626_v20, 0  ;;  %v2108_v20 = vmov 0  }
  0x9c   : > { %v630_v25 = vand.u32 31, %v628_v24  ;;  %v2279_v30 = vshrl.u32 %v628_v24, 5 }
  0x9e   : > { %v2274_v27 = vsub.s32 32, %v630_v25  ;;  %v642_v32 = vshll.u32 %v2102_v31, %v630_v25  ;;  %v645_v34 = vshll.u32 %v2103_v33, %v630_v25  ;;  %v633_v40 = vshll.u32 %v2105_v39, %v630_v25 }
  0x9f   : > { %v636_v43 = vshll.u32 %v2106_v41, %v630_v25  ;;  %v639_v46 = vshll.u32 %v2107_v44, %v630_v25  ;;  %vm651_vm3 = vcmp.lt.s32.totalorder %v2279_v30, 4  ;;  %vm648_vm4 = vcmp.lt.s32.totalorder %v2279_v30, 1 }
  0xa0   : > { %v643_v35 = vshrl.u32 %v2103_v33, %v2274_v27  ;;  %v646_v37 = vshrl.u32 %v2104_v36, %v2274_v27  ;;  %v634_v42 = vshrl.u32 %v2106_v41, %v2274_v27  ;;  %v637_v45 = vshrl.u32 %v2107_v44, %v2274_v27 }
  0xa1   : > { %v640_v47 = vshrl.u32 %v2102_v31, %v2274_v27  ;;  %vm650_vm5 = vcmp.lt.s32.totalorder %v2279_v30, 3  ;;  %vm649_vm6 = vcmp.lt.s32.totalorder %v2279_v30, 2  ;;  %v632_v25 = vshrl.u32 %v2105_v39, %v2274_v27 }
  0xa2   : > { %v644_v48 = vor.u32 %v643_v35, %v642_v32  ;;  %v647_v49 = vor.u32 %v646_v37, %v645_v34  ;;  %v635_v50 = vor.u32 %v634_v42, %v633_v40  ;;  %v638_v52 = vor.u32 %v637_v45, %v636_v43 }
  0xa3   : > { %v641_v53 = vor.u32 %v640_v47, %v639_v46 }
  0xa4   : > { %v657_v54 = vsel %vm651_vm3, %v644_v48, 920167782  ;;  %v661_v55 = vsel %vm651_vm3, %v647_v49, 1326507024  ;;  %v656_v56 = vsel %vm648_vm4, %v635_v50, %v638_v52  ;;  %v652_v35 = vsel %vm648_vm4, %v632_v25, %v635_v50 }
  0xa5   : > { %v658_v57 = vsel %vm650_vm5, %v641_v53, %v657_v54  ;;  %v660_v58 = vsel %vm648_vm4, %v638_v52, %v641_v53  ;;  %v662_v60 = vsel %vm650_vm5, %v644_v48, %v661_v55  ;;  %v653_v22 = vsel %vm651_vm3, %v641_v53, 2102212464 }
  0xa6   : > { %v659_v59 = vsel %vm649_vm6, %v656_v56, %v658_v57  ;;  %v663_v62 = vsel %vm649_vm6, %v660_v58, %v662_v60  ;;  %v654_v37 = vsel %vm650_vm5, %v638_v52, %v653_v22  ;;  %vm759_vm5 = vweird.f32 %v2247_v11 }
  0xa7   : > { %v689_v0 = vand.u32 65535, %v659_v59  ;;  %v690_v1 = vshrl.u32 %v659_v59, 16  ;;  %v667_v2 = vand.u32 65535, %v663_v62  ;;  %v668_v3 = vshrl.u32 %v663_v62, 16 }
  0xa8   : > { %v655_v46 = vsel %vm649_vm6, %v652_v35, %v654_v37 }
  0xa9   : > { %v692_v4 = vmul.u32 %v690_v1, %v665_v61  ;;  %v693_v5 = vmul.u32 %v689_v0, %v666_v63  ;;  %v670_v6 = vmul.u32 %v668_v3, %v665_v61  ;;  %v671_v7 = vmul.u32 %v667_v2, %v666_v63 }
  0xaa   : > { %v691_v8 = vmul.u32 %v689_v0, %v665_v61  ;;  %v669_v10 = vmul.u32 %v667_v2, %v665_v61  ;;  %v694_v13 = vmul.u32 %v690_v1, %v666_v63  ;;  %v672_v14 = vmul.u32 %v668_v3, %v666_v63 }
  0xab   : > { %v695_v9 = vshll.u32 %v692_v4, 16  ;;  %v673_v12 = vshll.u32 %v670_v6, 16  ;;  %v697_v15 = vshll.u32 %v693_v5, 16  ;;  %v675_v17 = vshll.u32 %v671_v7, 16 }
  0xac   : > { %v696_v32 = vshrl.u32 %v692_v4, 16  ;;  %v674_v38 = vshrl.u32 %v670_v6, 16  ;;  %v698_v42 = vshrl.u32 %v693_v5, 16  ;;  %v676_v45 = vshrl.u32 %v671_v7, 16 }
  0xad   : > { %vm699_vm7 = vc.u32 %v691_v8, %v695_v9  ;;  %v701_v16 = vadd.s32 %v695_v9, %v691_v8  ;;  %vm677_vm8 = vc.u32 %v669_v10, %v673_v12  ;;  %v679_v18 = vadd.s32 %v673_v12, %v669_v10 }
  0xae   : > { %v700_v21 = vsel %vm699_vm7, 1, %v2108_v20  ;;  %v678_v23 = vsel %vm677_vm8, 1, %v2108_v20  ;;  %v709_v54 = vmul.u32 %v2299_v51, %v655_v46 }
  0xaf   : > { %v702_v24 = vadd.s32 %v700_v21, %v694_v13  ;;  %vm703_vm9 = vc.u32 %v701_v16, %v697_v15  ;;  %v680_v26 = vadd.s32 %v678_v23, %v672_v14  ;;  %vm681_vm10 = vc.u32 %v679_v18, %v675_v17 }
  0xb0   : > { %v704_v28 = vsel %vm703_vm9, 1, %v2108_v20  ;;  %v682_v29 = vsel %vm681_vm10, 1, %v2108_v20  ;;  %v705_v49 = vadd.s32 %v701_v16, %v697_v15 }
  0xb1   : > { %v706_v34 = vadd.s32 %v704_v28, %v702_v24  ;;  %v684_v40 = vadd.s32 %v682_v29, %v680_v26 }
  0xb3   : > { %v707_v43 = vadd.s32 %v706_v34, %v696_v32  ;;  %v685_v27 = vadd.s32 %v684_v40, %v674_v38 }
  0xb5   : > { %v708_v47 = vadd.s32 %v707_v43, %v698_v42  ;;  %v686_v48 = vadd.s32 %v685_v27, %v676_v45 }
  0xb7   : > { %v712_v53 = vadd.s32 1, %v708_v47  ;;  %vm711_vm11 = vc.u32 %v686_v48, %v705_v49  ;;  %v710_v63 = vadd.s32 %v705_v49, %v686_v48  ;;  %v972_v48 = vld [vmem:[%s2885_s5 + $0x30] sm:$0xff]  ;;  %v971_v49 = vld [vmem:[%s2885_s5 + $0x28] sm:$0xff] }
  0xb9   : > { %v713_v50 = vsel %vm711_vm11, %v712_v53, %v708_v47  ;;  %v973_v47 = vld [vmem:[%s2885_s5 + $0x38] sm:$0xff]  ;;  %v2087_v53 = vld [vmem:[%s2884_s4] ss:$0 sm:$0xff] }
  0xba   : > { %v714_v55 = vadd.s32 %v713_v50, %v709_v54  ;;  %990 = vmatpush.msra.mxu3 %v973_v47  ;;  %v969_v54 = vld [vmem:[%s2885_s5 + $0x18] sm:$0xff]  ;;  %v968_v50 = vld [vmem:[%s2885_s5 + $0x10] sm:$0xff] }
  0xbc   : > { %v715_v56 = vadd.s32 536870912, %v714_v55  ;;  %991 = vmatpush.msra.mxu3 %v972_v48 }
  0xbe   : > { %v716_v52 = vshrl.u32 %v715_v56, 30  ;;  %992 = vmatpush.msra.mxu3 %v971_v49 }
  0xc0   : > { %v717_v57 = vshll.u32 %v716_v52, 30  ;;  %v740_v13 = vsub.s32 4, %v716_v52 }
  0xc2   : > { %v718_v58 = vsub.s32 %v714_v55, %v717_v57  ;;  %v741_v18 = vsel %vm618_vm14, %v740_v13, %v716_v52  ;;  %v967_v52 = vld [vmem:[%s2885_s5 + $0x8] sm:$0xff] }
  0xc3   : > { %v743_v23 = vsel %vm617_vm15, 0, %v741_v18 }
  0xc4   : > { %vm719_vm12 = vcmp.lt.s32.totalorder %v718_v58, 0  ;;  %v720_v59 = vsub.s32 0, %v718_v58  ;;  %v760_v29 = vadd.s32 3, %v743_v23 }
  0xc6   : > { %v721_v60 = vsel %vm719_vm12, %v720_v59, %v718_v58  ;;  %v761_v37 = vand.u32 3, %v760_v29 }
  0xc7   : > { %v722_v61 = vclz %v721_v60 }
  0xc8   : > { %vm763_vm2 = vcmp.eq.s32.totalorder %v761_v37, 0  ;;  %vm766_vm3 = vcmp.eq.s32.totalorder %v761_v37, 2  ;;  %vm762_vm4 = vcmp.lt.s32.totalorder %v761_v37, 2 }
  0xc9   : > { %v2043_v62 = vadd.s32 4294967294, %v722_v61 }
  0xcb   : > { %vm2044_vm13 = vcmp.lt.s32.totalorder %v2043_v62, 0 }
  0xcc   : > { %v725_v30 = vsel %vm2044_vm13, 0, %v2043_v62 }
  0xcd   : > { %v726_v0 = vsub.s32 32, %v725_v30  ;;  %v730_v1 = vsub.s32 4294967266, %v725_v30  ;;  %v727_v2 = vshll.u32 %v718_v58, %v725_v30  ;;  %v966_v58 = vld [vmem:[%s2885_s5] sm:$0xff] }
  0xcf   : > { %v728_v3 = vshrl.u32 %v710_v63, %v726_v0  ;;  %v731_v51 = vadd.s32 127, %v730_v1 }
  0xd1   : > { %v729_v4 = vor.u32 %v728_v3, %v727_v2  ;;  %v732_v5 = vshll.u32 %v731_v51, 23 }
  0xd3   : > { %v733_v6 = vor.u32 4788187, %v732_v5  ;;  %v736_v8 = vcvt.s32.f32 %v729_v4 }
  0xd5   : > { %v734_v7 = vand.u32 2147483647, %v733_v6 }
  0xd7   : > { %v737_v9 = vmul.f32 %v736_v8, %v734_v7 }
  0xd9   : > { %v738_v10 = vxor.u32 2147483648, %v737_v9 }
  0xdb   : > { %v739_v12 = vsel %vm618_vm14, %v738_v10, %v737_v9 }
  0xdc   : > { %v742_v14 = vsel %vm617_vm15, %v2247_v11, %v739_v12  ;;  %v970_v11 = vld [vmem:[%s2885_s5 + $0x20] sm:$0xff] }
  0xdd   : > { %v744_v15 = vmul.f32 %v742_v14, %v742_v14  ;;  %993 = vmatpush.msra.mxu3 %v970_v11 }
  0xdf   : > { %v745_v16 = vmul.f32 -0.001358992, %v744_v15  ;;  %v752_v17 = vmul.f32 -0.00019511016, %v744_v15  ;;  %994 = vmatpush.msra.mxu3 %v969_v54 }
  0xe1   : > { %v746_v21 = vadd.f32 0.041655596, %v745_v16  ;;  %v753_v22 = vadd.f32 0.008332121, %v752_v17  ;;  %995 = vmatpush.msra.mxu3 %v968_v50 }
  0xe3   : > { %v747_v24 = vmul.f32 %v746_v21, %v744_v15  ;;  %v754_v25 = vmul.f32 %v753_v22, %v744_v15  ;;  %996 = vmatpush.msra.mxu3 %v967_v52 }
  0xe5   : > { %v748_v26 = vadd.f32 -0.4999988, %v747_v24  ;;  %v755_v28 = vadd.f32 -0.16666654, %v754_v25  ;;  %997 = vmatpush.msra.mxu3 %v966_v58 }
  0xe7   : > { %v749_v32 = vmul.f32 %v748_v26, %v744_v15  ;;  %v756_v34 = vmul.f32 %v755_v28, %v744_v15 }
  0xe9   : > { %v750_v35 = vadd.f32 1.0, %v749_v32  ;;  %v757_v19 = vadd.f32 1.0, %v756_v34 }
  0xeb   : > { %v758_v38 = vmul.f32 %v757_v19, %v742_v14  ;;  %v767_v40 = vxor.u32 2147483648, %v750_v35 }
  0xed   : > { %v764_v42 = vxor.u32 2147483648, %v758_v38  ;;  %v768_v45 = vsel %vm766_vm3, %v767_v40, %v758_v38 }
  0xef   : > { %v765_v43 = vsel %vm763_vm2, %v750_v35, %v764_v42 }
  0xf0   : > { %v769_v27 = vsel %vm762_vm4, %v765_v43, %v768_v45 }
  0xf1   : > { %v770_v46 = vsel %vm759_vm5, nan, %v769_v27 }
  0xf2   : > { %807 = vmatmul.f32.vlgmr.msra.gmra.mxu1 %v770_v46 }
 0x16f   : > { %v808_v55 = vpop.f32.mrf.mxu1 }
 0x170   : > { %v2364_v56 = vadd.f32 %v2087_v53, %v808_v55 }
 0x172   : > { %v814_v57 = vand.u32 2139095040, %v2364_v56  ;;  %v811_v60 = vand.u32 2147483647, %v2364_v56  ;;  %vm813_vm4 = vcmp.lt.s32.totalorder %v2364_v56, 0 }
 0x174   : > { %v815_v59 = vshrl.u32 %v814_v57, 23  ;;  %v818_v30 = vand.u32 8388607, %v811_v60  ;;  %vm812_vm5 = vcmp.le.f32.partialorder %v811_v60, 0.7853982 }
 0x176   : > { %v2045_v61 = vadd.s32 4294967169, %v815_v59  ;;  %v819_v1 = vor.u32 8388608, %v818_v30 }
 0x178   : > { %v821_v62 = vadd.s32 1, %v2045_v61  ;;  %v2388_v14 = vshll.u32 %v819_v1, 8 }
 0x17a   : > { %vm822_vm6 = vcmp.gt.s32.totalorder %v821_v62, 0  ;;  %v860_v29 = vand.u32 65535, %v2388_v14  ;;  %v861_v34 = vshrl.u32 %v2388_v14, 16 }
 0x17b   : > { %v823_v63 = vsel %vm822_vm6, %v821_v62, 0 }
 0x17c   : > { %v825_v0 = vand.u32 31, %v823_v63  ;;  %v2376_v2 = vshrl.u32 %v823_v63, 5 }
 0x17e   : > { %v826_v3 = vsub.s32 32, %v825_v0  ;;  %v828_v51 = vshll.u32 %v2105_v39, %v825_v0  ;;  %v831_v4 = vshll.u32 %v2106_v41, %v825_v0  ;;  %v834_v5 = vshll.u32 %v2107_v44, %v825_v0 }
 0x17f   : > { %v837_v6 = vshll.u32 %v2102_v31, %v825_v0  ;;  %v840_v12 = vshll.u32 %v2103_v33, %v825_v0  ;;  %vm843_vm7 = vcmp.lt.s32.totalorder %v2376_v2, 1  ;;  %vm846_vm8 = vcmp.lt.s32.totalorder %v2376_v2, 4 }
 0x180   : > { %v829_v7 = vshrl.u32 %v2106_v41, %v826_v3  ;;  %v832_v8 = vshrl.u32 %v2107_v44, %v826_v3  ;;  %v835_v9 = vshrl.u32 %v2102_v31, %v826_v3  ;;  %v838_v10 = vshrl.u32 %v2103_v33, %v826_v3 }
 0x181   : > { %v841_v13 = vshrl.u32 %v2104_v36, %v826_v3  ;;  %vm845_vm9 = vcmp.lt.s32.totalorder %v2376_v2, 3  ;;  %vm844_vm10 = vcmp.lt.s32.totalorder %v2376_v2, 2  ;;  %v827_v62 = vshrl.u32 %v2105_v39, %v826_v3 }
 0x182   : > { %v830_v15 = vor.u32 %v829_v7, %v828_v51  ;;  %v833_v16 = vor.u32 %v832_v8, %v831_v4  ;;  %v836_v17 = vor.u32 %v835_v9, %v834_v5  ;;  %v839_v18 = vor.u32 %v838_v10, %v837_v6 }
 0x183   : > { %v842_v21 = vor.u32 %v841_v13, %v840_v12 }
 0x184   : > { %v851_v22 = vsel %vm843_vm7, %v830_v15, %v833_v16  ;;  %v852_v23 = vsel %vm846_vm8, %v839_v18, 920167782  ;;  %v855_v24 = vsel %vm843_vm7, %v833_v16, %v836_v17  ;;  %v848_v58 = vsel %vm846_vm8, %v836_v17, 2102212464 }
 0x185   : > { %v853_v25 = vsel %vm845_vm9, %v836_v17, %v852_v23  ;;  %v856_v26 = vsel %vm846_vm8, %v842_v21, 1326507024  ;;  %v847_v4 = vsel %vm843_vm7, %v827_v62, %v830_v15  ;;  %v849_v5 = vsel %vm845_vm9, %v833_v16, %v848_v58 }
 0x186   : > { %v857_v28 = vsel %vm845_vm9, %v839_v18, %v856_v26  ;;  %v854_v32 = vsel %vm844_vm10, %v851_v22, %v853_v25  ;;  %v850_v12 = vsel %vm844_vm10, %v847_v4, %v849_v5  ;;  %vm978_vm9 = vcmask 523264  }
 0x187   : > { %v858_v35 = vsel %vm844_vm10, %v855_v24, %v857_v28  ;;  %v884_v19 = vand.u32 65535, %v854_v32  ;;  %v885_v37 = vshrl.u32 %v854_v32, 16  ;;  %v904_v22 = vmul.u32 %v2388_v14, %v850_v12 }
 0x188   : > { %v862_v38 = vand.u32 65535, %v858_v35  ;;  %v863_v40 = vshrl.u32 %v858_v35, 16  ;;  %vm954_vm10 = vweird.f32 %v2364_v56 }
 0x189   : > { %v887_v42 = vmul.u32 %v885_v37, %v860_v29  ;;  %v888_v43 = vmul.u32 %v884_v19, %v861_v34  ;;  %v886_v46 = vmul.u32 %v884_v19, %v860_v29  ;;  %v889_v11 = vmul.u32 %v885_v37, %v861_v34 }
 0x18a   : > { %v865_v45 = vmul.u32 %v863_v40, %v860_v29  ;;  %v866_v27 = vmul.u32 %v862_v38, %v861_v34  ;;  %v864_v48 = vmul.u32 %v862_v38, %v860_v29  ;;  %v867_v53 = vmul.u32 %v863_v40, %v861_v34 }
 0x18b   : > { %v890_v47 = vshll.u32 %v887_v42, 16  ;;  %v892_v54 = vshll.u32 %v888_v43, 16  ;;  %v891_v1 = vshrl.u32 %v887_v42, 16  ;;  %v893_v8 = vshrl.u32 %v888_v43, 16 }
 0x18c   : > { %v868_v49 = vshll.u32 %v865_v45, 16  ;;  %v870_v55 = vshll.u32 %v866_v27, 16  ;;  %v869_v6 = vshrl.u32 %v865_v45, 16  ;;  %v871_v10 = vshrl.u32 %v866_v27, 16 }
 0x18d   : > { %vm894_vm11 = vc.u32 %v886_v46, %v890_v47  ;;  %v896_v50 = vadd.s32 %v890_v47, %v886_v46 }
 0x18e   : > { %vm872_vm12 = vc.u32 %v864_v48, %v868_v49  ;;  %v874_v52 = vadd.s32 %v868_v49, %v864_v48  ;;  %v895_v57 = vsel %vm894_vm11, 1, %v2108_v20 }
 0x18f   : > { %v873_v59 = vsel %vm872_vm12, 1, %v2108_v20  ;;  %v897_v61 = vadd.s32 %v895_v57, %v889_v11  ;;  %vm898_vm13 = vc.u32 %v896_v50, %v892_v54  ;;  %v900_v18 = vadd.s32 %v896_v50, %v892_v54 }
 0x190   : > { %v875_v30 = vadd.s32 %v873_v59, %v867_v53  ;;  %vm876_vm14 = vc.u32 %v874_v52, %v870_v55  ;;  %v899_v63 = vsel %vm898_vm13, 1, %v2108_v20 }
 0x191   : > { %v877_v0 = vsel %vm876_vm14, 1, %v2108_v20  ;;  %v901_v51 = vadd.s32 %v899_v63, %v897_v61 }
 0x192   : > { %v879_v7 = vadd.s32 %v877_v0, %v875_v30 }
 0x193   : > { %v902_v9 = vadd.s32 %v901_v51, %v891_v1 }
 0x194   : > { %v880_v3 = vadd.s32 %v879_v7, %v869_v6 }
 0x195   : > { %v903_v13 = vadd.s32 %v902_v9, %v893_v8 }
 0x196   : > { %v881_v17 = vadd.s32 %v880_v3, %v871_v10 }
 0x197   : > { %v907_v21 = vadd.s32 1, %v903_v13 }
 0x198   : > { %vm906_vm15 = vc.u32 %v881_v17, %v900_v18  ;;  %v905_v35 = vadd.s32 %v900_v18, %v881_v17 }
 0x199   : > { %v908_v15 = vsel %vm906_vm15, %v907_v21, %v903_v13  ;;  %v2088_v13 = vld [vmem:[%s2886_s6] ss:$0 sm:$0xff]  ;;  %v1160_v21 = vld [vmem:[%s2887_s7 + $0x18] sm:$0xff] }
 0x19a   : > { %v909_v23 = vadd.s32 %v908_v15, %v904_v22  ;;  %v1159_v22 = vld [vmem:[%s2887_s7 + $0x10] sm:$0xff]  ;;  %1181 = vmatpush.msrb.mxu3 %v1160_v21  ;;  %v1158_v15 = vld [vmem:[%s2887_s7 + $0x8] sm:$0xff] }
 0x19c   : > { %v910_v24 = vadd.s32 536870912, %v909_v23  ;;  %1182 = vmatpush.msrb.mxu3 %v1159_v22 }
 0x19e   : > { %v911_v16 = vshrl.u32 %v910_v24, 30  ;;  %v1157_v24 = vld [vmem:[%s2887_s7] sm:$0xff]  ;;  %1183 = vmatpush.msrb.mxu3 %v1158_v15 }
 0x1a0   : > { %v912_v25 = vshll.u32 %v911_v16, 30  ;;  %v935_v11 = vsub.s32 4, %v911_v16  ;;  %1184 = vmatpush.msrb.mxu3 %v1157_v24 }
 0x1a2   : > { %v913_v26 = vsub.s32 %v909_v23, %v912_v25  ;;  %v936_v52 = vsel %vm813_vm4, %v935_v11, %v911_v16 }
 0x1a3   : > { %v938_v59 = vsel %vm812_vm5, 0, %v936_v52 }
 0x1a4   : > { %vm914_vm2 = vcmp.lt.s32.totalorder %v913_v26, 0  ;;  %v915_v28 = vsub.s32 0, %v913_v26  ;;  %v955_v0 = vadd.s32 3, %v938_v59 }
 0x1a6   : > { %v916_v29 = vsel %vm914_vm2, %v915_v28, %v913_v26  ;;  %v956_v5 = vand.u32 3, %v955_v0 }
 0x1a7   : > { %v917_v32 = vclz %v916_v29 }
 0x1a8   : > { %vm958_vm6 = vcmp.eq.s32.totalorder %v956_v5, 0  ;;  %vm961_vm7 = vcmp.eq.s32.totalorder %v956_v5, 2  ;;  %vm957_vm8 = vcmp.lt.s32.totalorder %v956_v5, 2 }
 0x1a9   : > { %v2046_v34 = vadd.s32 4294967294, %v917_v32 }
 0x1ab   : > { %vm2047_vm3 = vcmp.lt.s32.totalorder %v2046_v34, 0 }
 0x1ac   : > { %v920_v2 = vsel %vm2047_vm3, 0, %v2046_v34 }
 0x1ad   : > { %v921_v19 = vsub.s32 32, %v920_v2  ;;  %v925_v37 = vsub.s32 4294967266, %v920_v2  ;;  %v922_v38 = vshll.u32 %v913_v26, %v920_v2 }
 0x1af   : > { %v923_v40 = vshrl.u32 %v905_v35, %v921_v19  ;;  %v926_v14 = vadd.s32 127, %v925_v37 }
 0x1b1   : > { %v924_v42 = vor.u32 %v923_v40, %v922_v38  ;;  %v927_v43 = vshll.u32 %v926_v14, 23 }
 0x1b3   : > { %v928_v45 = vor.u32 4788187, %v927_v43  ;;  %v931_v46 = vcvt.s32.f32 %v924_v42 }
 0x1b5   : > { %v929_v27 = vand.u32 2147483647, %v928_v45 }
 0x1b7   : > { %v932_v47 = vmul.f32 %v931_v46, %v929_v27 }
 0x1b9   : > { %v933_v48 = vxor.u32 2147483648, %v932_v47 }
 0x1bb   : > { %v934_v49 = vsel %vm813_vm4, %v933_v48, %v932_v47 }
 0x1bc   : > { %v937_v53 = vsel %vm812_vm5, %v2364_v56, %v934_v49 }
 0x1bd   : > { %v939_v54 = vmul.f32 %v937_v53, %v937_v53 }
 0x1bf   : > { %v940_v50 = vmul.f32 -0.001358992, %v939_v54  ;;  %v947_v55 = vmul.f32 -0.00019511016, %v939_v54 }
 0x1c1   : > { %v941_v57 = vadd.f32 0.041655596, %v940_v50  ;;  %v948_v58 = vadd.f32 0.008332121, %v947_v55 }
 0x1c3   : > { %v942_v61 = vmul.f32 %v941_v57, %v939_v54  ;;  %v949_v62 = vmul.f32 %v948_v58, %v939_v54 }
 0x1c5   : > { %v943_v30 = vadd.f32 -0.4999988, %v942_v61  ;;  %v950_v63 = vadd.f32 -0.16666654, %v949_v62 }
 0x1c7   : > { %v944_v1 = vmul.f32 %v943_v30, %v939_v54  ;;  %v951_v51 = vmul.f32 %v950_v63, %v939_v54 }
 0x1c9   : > { %v945_v4 = vadd.f32 1.0, %v944_v1  ;;  %v952_v60 = vadd.f32 1.0, %v951_v51 }
 0x1cb   : > { %v953_v6 = vmul.f32 %v952_v60, %v937_v53  ;;  %v962_v7 = vxor.u32 2147483648, %v945_v4 }
 0x1cd   : > { %v959_v8 = vxor.u32 2147483648, %v953_v6  ;;  %v963_v10 = vsel %vm961_vm7, %v962_v7, %v953_v6 }
 0x1cf   : > { %v960_v9 = vsel %vm958_vm6, %v945_v4, %v959_v8 }
 0x1d0   : > { %v964_v3 = vsel %vm957_vm8, %v960_v9, %v963_v10 }
 0x1d1   : > { %v965_v12 = vsel %vm954_vm10, nan, %v964_v3 }
 0x1d2   : > { %2048 = vmatmul.msk.f32.vlgmr.msra.gmra.mxu3 %vm978_vm9, %v965_v12 }
 0x255   : > { %v999_v17 = vpop.f32.mrf.mxu3 }
 0x256   : > { %v2435_v18 = vadd.f32 %v2088_v13, %v999_v17 }
 0x258   : > { %v1005_v56 = vand.u32 2139095040, %v2435_v18  ;;  %v1002_v25 = vand.u32 2147483647, %v2435_v18  ;;  %vm1004_vm10 = vcmp.lt.s32.totalorder %v2435_v18, 0 }
 0x25a   : > { %v1006_v23 = vshrl.u32 %v1005_v56, 23  ;;  %v1009_v28 = vand.u32 8388607, %v1002_v25 }
 0x25c   : > { %v2049_v16 = vadd.s32 4294967169, %v1006_v23  ;;  %v1010_v2 = vor.u32 8388608, %v1009_v28 }
 0x25e   : > { %v1012_v26 = vadd.s32 1, %v2049_v16  ;;  %v2466_v54 = vshll.u32 %v1010_v2, 8 }
 0x260   : > { %vm1013_vm11 = vcmp.gt.s32.totalorder %v1012_v26, 0  ;;  %v1051_v30 = vand.u32 65535, %v2466_v54  ;;  %v1052_v63 = vshrl.u32 %v2466_v54, 16 }
 0x261   : > { %v1014_v29 = vsel %vm1013_vm11, %v1012_v26, 0  ;;  %vm1003_vm11 = vcmp.le.f32.partialorder %v1002_v25, 0.7853982 }
 0x262   : > { %v1016_v32 = vand.u32 31, %v1014_v29  ;;  %v2453_v35 = vshrl.u32 %v1014_v29, 5 }
 0x264   : > { %v1017_v34 = vsub.s32 32, %v1016_v32  ;;  %v1019_v19 = vshll.u32 %v2105_v39, %v1016_v32  ;;  %v1022_v37 = vshll.u32 %v2106_v41, %v1016_v32  ;;  %v1025_v14 = vshll.u32 %v2107_v44, %v1016_v32 }
 0x265   : > { %v1028_v43 = vshll.u32 %v2102_v31, %v1016_v32  ;;  %v1031_v27 = vshll.u32 %v2103_v33, %v1016_v32  ;;  %vm1034_vm12 = vcmp.lt.s32.totalorder %v2453_v35, 1  ;;  %vm1037_vm13 = vcmp.lt.s32.totalorder %v2453_v35, 4 }
 0x266   : > { %v1020_v38 = vshrl.u32 %v2106_v41, %v1017_v34  ;;  %v1023_v40 = vshrl.u32 %v2107_v44, %v1017_v34  ;;  %v1026_v42 = vshrl.u32 %v2102_v31, %v1017_v34  ;;  %v1029_v45 = vshrl.u32 %v2103_v33, %v1017_v34 }
 0x267   : > { %v1032_v46 = vshrl.u32 %v2104_v36, %v1017_v34  ;;  %vm1036_vm14 = vcmp.lt.s32.totalorder %v2453_v35, 3  ;;  %vm1035_vm15 = vcmp.lt.s32.totalorder %v2453_v35, 2  ;;  %v1018_v29 = vshrl.u32 %v2105_v39, %v1017_v34 }
 0x268   : > { %v1021_v47 = vor.u32 %v1020_v38, %v1019_v19  ;;  %v1024_v48 = vor.u32 %v1023_v40, %v1022_v37  ;;  %v1027_v49 = vor.u32 %v1026_v42, %v1025_v14  ;;  %v1030_v11 = vor.u32 %v1029_v45, %v1028_v43 }
 0x269   : > { %v1033_v53 = vor.u32 %v1032_v46, %v1031_v27 }
 0x26a   : > { %v1042_v50 = vsel %vm1034_vm12, %v1021_v47, %v1024_v48  ;;  %v1046_v55 = vsel %vm1034_vm12, %v1024_v48, %v1027_v49  ;;  %v1043_v52 = vsel %vm1037_vm13, %v1030_v11, 920167782  ;;  %v1039_v16 = vsel %vm1037_vm13, %v1027_v49, 2102212464 }
 0x26b   : > { %v1047_v57 = vsel %vm1037_vm13, %v1033_v53, 1326507024  ;;  %v1044_v58 = vsel %vm1036_vm14, %v1027_v49, %v1043_v52  ;;  %v1038_v40 = vsel %vm1034_vm12, %v1018_v29, %v1021_v47  ;;  %v1040_v14 = vsel %vm1036_vm14, %v1024_v48, %v1039_v16 }
 0x26c   : > { %v1048_v59 = vsel %vm1036_vm14, %v1030_v11, %v1047_v57  ;;  %v1045_v61 = vsel %vm1035_vm15, %v1042_v50, %v1044_v58  ;;  %v1041_v34 = vsel %vm1035_vm15, %v1038_v40, %v1040_v14 }
 0x26d   : > { %v1049_v62 = vsel %vm1035_vm15, %v1046_v55, %v1048_v59  ;;  %v1075_v51 = vand.u32 65535, %v1045_v61  ;;  %v1076_v4 = vshrl.u32 %v1045_v61, 16  ;;  %v1095_v50 = vmul.u32 %v2466_v54, %v1041_v34 }
 0x26e   : > { %v1053_v0 = vand.u32 65535, %v1049_v62  ;;  %v1054_v1 = vshrl.u32 %v1049_v62, 16  ;;  %vm1165_vm15 = vcmask 261120  }
 0x26f   : > { %v1078_v6 = vmul.u32 %v1076_v4, %v1051_v30  ;;  %v1079_v7 = vmul.u32 %v1075_v51, %v1052_v63  ;;  %v1077_v3 = vmul.u32 %v1075_v51, %v1051_v30  ;;  %v1080_v21 = vmul.u32 %v1076_v4, %v1052_v63 }
 0x270   : > { %v1056_v60 = vmul.u32 %v1054_v1, %v1051_v30  ;;  %v1057_v5 = vmul.u32 %v1053_v0, %v1052_v63  ;;  %v1055_v8 = vmul.u32 %v1053_v0, %v1051_v30  ;;  %v1058_v10 = vmul.u32 %v1054_v1, %v1052_v63 }
 0x271   : > { %v1081_v12 = vshll.u32 %v1078_v6, 16  ;;  %v1083_v56 = vshll.u32 %v1079_v7, 16  ;;  %v1082_v37 = vshrl.u32 %v1078_v6, 16  ;;  %v1084_v45 = vshrl.u32 %v1079_v7, 16 }
 0x272   : > { %v1059_v9 = vshll.u32 %v1056_v60, 16  ;;  %v1061_v13 = vshll.u32 %v1057_v5, 16  ;;  %v1060_v32 = vshrl.u32 %v1056_v60, 16  ;;  %v1062_v42 = vshrl.u32 %v1057_v5, 16 }
 0x273   : > { %vm1085_vm3 = vc.u32 %v1077_v3, %v1081_v12  ;;  %v1087_v15 = vadd.s32 %v1081_v12, %v1077_v3 }
 0x274   : > { %vm1063_vm2 = vc.u32 %v1055_v8, %v1059_v9  ;;  %v1065_v17 = vadd.s32 %v1059_v9, %v1055_v8  ;;  %v1086_v24 = vsel %vm1085_vm3, 1, %v2108_v20 }
 0x275   : > { %v1064_v22 = vsel %vm1063_vm2, 1, %v2108_v20  ;;  %v1088_v28 = vadd.s32 %v1086_v24, %v1080_v21  ;;  %vm1089_vm5 = vc.u32 %v1087_v15, %v1083_v56  ;;  %v1091_v49 = vadd.s32 %v1087_v15, %v1083_v56 }
 0x276   : > { %v1066_v23 = vadd.s32 %v1064_v22, %v1058_v10  ;;  %vm1067_vm4 = vc.u32 %v1065_v17, %v1061_v13  ;;  %v1090_v19 = vsel %vm1089_vm5, 1, %v2108_v20  ;;  %vm1145_vm2 = vweird.f32 %v2435_v18 }
 0x277   : > { %v1068_v26 = vsel %vm1067_vm4, 1, %v2108_v20  ;;  %v1092_v38 = vadd.s32 %v1090_v19, %v1088_v28 }
 0x278   : > { %v1070_v2 = vadd.s32 %v1068_v26, %v1066_v23 }
 0x279   : > { %v1093_v27 = vadd.s32 %v1092_v38, %v1082_v37 }
 0x27a   : > { %v1071_v43 = vadd.s32 %v1070_v2, %v1060_v32 }
 0x27b   : > { %v1094_v11 = vadd.s32 %v1093_v27, %v1084_v45 }
 0x27c   : > { %v1072_v46 = vadd.s32 %v1071_v43, %v1062_v42 }
 0x27d   : > { %v1098_v53 = vadd.s32 1, %v1094_v11 }
 0x27e   : > { %vm1097_vm6 = vc.u32 %v1072_v46, %v1091_v49  ;;  %v1096_v35 = vadd.s32 %v1091_v49, %v1072_v46  ;;  %v2089_v49 = vld [vmem:[%s2888_s8] ss:$0 sm:$0xff] }
 0x27f   : > { %v1099_v55 = vsel %vm1097_vm6, %v1098_v53, %v1094_v11  ;;  %v1345_v53 = vld [vmem:[%s2889_s9] sm:$0xf] }
 0x280   : > { %v1100_v52 = vadd.s32 %v1099_v55, %v1095_v50  ;;  %2056 = vmatpush.msk.msrb.mxu0 %vm592_vm0, %v1345_v53 }
 0x282   : > { %v1101_v47 = vadd.s32 536870912, %v1100_v52 }
 0x284   : > { %v1102_v57 = vshrl.u32 %v1101_v47, 30 }
 0x286   : > { %v1103_v58 = vshll.u32 %v1102_v57, 30  ;;  %v1126_v12 = vsub.s32 4, %v1102_v57 }
 0x288   : > { %v1104_v48 = vsub.s32 %v1100_v52, %v1103_v58  ;;  %v1127_v56 = vsel %vm1004_vm10, %v1126_v12, %v1102_v57 }
 0x289   : > { %v1129_v24 = vsel %vm1003_vm11, 0, %v1127_v56 }
 0x28a   : > { %vm1105_vm7 = vcmp.lt.s32.totalorder %v1104_v48, 0  ;;  %v1106_v59 = vsub.s32 0, %v1104_v48  ;;  %v1146_v32 = vadd.s32 3, %v1129_v24 }
 0x28c   : > { %v1107_v61 = vsel %vm1105_vm7, %v1106_v59, %v1104_v48  ;;  %v1147_v38 = vand.u32 3, %v1146_v32 }
 0x28d   : > { %v1108_v62 = vclz %v1107_v61 }
 0x28e   : > { %vm1149_vm12 = vcmp.eq.s32.totalorder %v1147_v38, 0  ;;  %vm1152_vm13 = vcmp.eq.s32.totalorder %v1147_v38, 2  ;;  %vm1148_vm14 = vcmp.lt.s32.totalorder %v1147_v38, 2 }
 0x28f   : > { %v2050_v30 = vadd.s32 4294967294, %v1108_v62 }
 0x291   : > { %vm2051_vm8 = vcmp.lt.s32.totalorder %v2050_v30, 0 }
 0x292   : > { %v1111_v63 = vsel %vm2051_vm8, 0, %v2050_v30 }
 0x293   : > { %v1112_v0 = vsub.s32 32, %v1111_v63  ;;  %v1116_v1 = vsub.s32 4294967266, %v1111_v63  ;;  %v1113_v51 = vshll.u32 %v1104_v48, %v1111_v63 }
 0x295   : > { %v1114_v4 = vshrl.u32 %v1096_v35, %v1112_v0  ;;  %v1117_v60 = vadd.s32 127, %v1116_v1 }
 0x297   : > { %v1115_v54 = vor.u32 %v1114_v4, %v1113_v51  ;;  %v1118_v5 = vshll.u32 %v1117_v60, 23 }
 0x299   : > { %v1119_v6 = vor.u32 4788187, %v1118_v5  ;;  %v1122_v8 = vcvt.s32.f32 %v1115_v54 }
 0x29b   : > { %v1120_v7 = vand.u32 2147483647, %v1119_v6 }
 0x29d   : > { %v1123_v9 = vmul.f32 %v1122_v8, %v1120_v7 }
 0x29f   : > { %v1124_v10 = vxor.u32 2147483648, %v1123_v9 }
 0x2a1   : > { %v1125_v3 = vsel %vm1004_vm10, %v1124_v10, %v1123_v9 }
 0x2a2   : > { %v1128_v13 = vsel %vm1003_vm11, %v2435_v18, %v1125_v3 }
 0x2a3   : > { %v1130_v17 = vmul.f32 %v1128_v13, %v1128_v13 }
 0x2a5   : > { %v1131_v21 = vmul.f32 -0.001358992, %v1130_v17  ;;  %v1138_v22 = vmul.f32 -0.00019511016, %v1130_v17 }
 0x2a7   : > { %v1132_v15 = vadd.f32 0.041655596, %v1131_v21  ;;  %v1139_v23 = vadd.f32 0.008332121, %v1138_v22 }
 0x2a9   : > { %v1133_v16 = vmul.f32 %v1132_v15, %v1130_v17  ;;  %v1140_v26 = vmul.f32 %v1139_v23, %v1130_v17 }
 0x2ab   : > { %v1134_v28 = vadd.f32 -0.4999988, %v1133_v16  ;;  %v1141_v29 = vadd.f32 -0.16666654, %v1140_v26 }
 0x2ad   : > { %v1135_v2 = vmul.f32 %v1134_v28, %v1130_v17  ;;  %v1142_v19 = vmul.f32 %v1141_v29, %v1130_v17 }
 0x2af   : > { %v1136_v37 = vadd.f32 1.0, %v1135_v2  ;;  %v1143_v25 = vadd.f32 1.0, %v1142_v19 }
 0x2b1   : > { %v1144_v40 = vmul.f32 %v1143_v25, %v1128_v13  ;;  %v1153_v14 = vxor.u32 2147483648, %v1136_v37 }
 0x2b3   : > { %v1150_v42 = vxor.u32 2147483648, %v1144_v40  ;;  %v1154_v45 = vsel %vm1152_vm13, %v1153_v14, %v1144_v40 }
 0x2b5   : > { %v1151_v43 = vsel %vm1149_vm12, %v1136_v37, %v1150_v42 }
 0x2b6   : > { %v1155_v27 = vsel %vm1148_vm14, %v1151_v43, %v1154_v45 }
 0x2b7   : > { %v1156_v46 = vsel %vm1145_vm2, nan, %v1155_v27 }
 0x2b8   : > { %2052 = vmatmul.msk.f32.vlgmr.msrb.gmra.mxu3 %vm1165_vm15, %v1156_v46 }
 0x33b   : > { %v1186_v34 = vpop.f32.mrf.mxu3 }
 0x33c   : > { %v2512_v11 = vadd.f32 %v2089_v49, %v1186_v34 }
 0x33e   : > { %v1192_v50 = vand.u32 2139095040, %v2512_v11  ;;  %v1189_v52 = vand.u32 2147483647, %v2512_v11  ;;  %vm1191_vm2 = vcmp.lt.s32.totalorder %v2512_v11, 0 }
 0x340   : > { %v1193_v18 = vshrl.u32 %v1192_v50, 23  ;;  %v1196_v57 = vand.u32 8388607, %v1189_v52 }
 0x342   : > { %v2053_v55 = vadd.s32 4294967169, %v1193_v18  ;;  %v1197_v61 = vor.u32 8388608, %v1196_v57 }
 0x344   : > { %v1199_v47 = vadd.s32 1, %v2053_v55  ;;  %v2535_v3 = vshll.u32 %v1197_v61, 8 }
 0x346   : > { %vm1200_vm3 = vcmp.gt.s32.totalorder %v1199_v47, 0  ;;  %v1238_v24 = vand.u32 65535, %v2535_v3  ;;  %v1239_v16 = vshrl.u32 %v2535_v3, 16 }
 0x347   : > { %v1201_v58 = vsel %vm1200_vm3, %v1199_v47, 0  ;;  %vm1190_vm3 = vcmp.le.f32.partialorder %v1189_v52, 0.7853982 }
 0x348   : > { %v1203_v48 = vand.u32 31, %v1201_v58  ;;  %v2522_v62 = vshrl.u32 %v1201_v58, 5 }
 0x34a   : > { %v1204_v59 = vsub.s32 32, %v1203_v48  ;;  %v1206_v30 = vshll.u32 %v2105_v39, %v1203_v48  ;;  %v1209_v63 = vshll.u32 %v2106_v41, %v1203_v48  ;;  %v1212_v1 = vshll.u32 %v2107_v44, %v1203_v48 }
 0x34b   : > { %v1215_v4 = vshll.u32 %v2102_v31, %v1203_v48  ;;  %v1218_v54 = vshll.u32 %v2103_v33, %v1203_v48  ;;  %vm1221_vm0 = vcmp.lt.s32.totalorder %v2522_v62, 1  ;;  %vm1224_vm4 = vcmp.lt.s32.totalorder %v2522_v62, 4 }
 0x34c   : > { %v1207_v35 = vshrl.u32 %v2106_v41, %v1204_v59  ;;  %v1210_v0 = vshrl.u32 %v2107_v44, %v1204_v59  ;;  %v1213_v51 = vshrl.u32 %v2102_v31, %v1204_v59  ;;  %v1216_v60 = vshrl.u32 %v2103_v33, %v1204_v59 }
 0x34d   : > { %v1219_v5 = vshrl.u32 %v2104_v36, %v1204_v59  ;;  %vm1223_vm5 = vcmp.lt.s32.totalorder %v2522_v62, 3  ;;  %vm1222_vm6 = vcmp.lt.s32.totalorder %v2522_v62, 2  ;;  %v1205_v58 = vshrl.u32 %v2105_v39, %v1204_v59 }
 0x34e   : > { %v1208_v6 = vor.u32 %v1207_v35, %v1206_v30  ;;  %v1211_v7 = vor.u32 %v1210_v0, %v1209_v63  ;;  %v1214_v8 = vor.u32 %v1213_v51, %v1212_v1  ;;  %v1217_v9 = vor.u32 %v1216_v60, %v1215_v4 }
 0x34f   : > { %v1220_v10 = vor.u32 %v1219_v5, %v1218_v54 }
 0x350   : > { %v1229_v12 = vsel %vm1221_vm0, %v1208_v6, %v1211_v7  ;;  %v1233_v13 = vsel %vm1221_vm0, %v1211_v7, %v1214_v8  ;;  %v1230_v17 = vsel %vm1224_vm4, %v1217_v9, 920167782  ;;  %v1226_v55 = vsel %vm1224_vm4, %v1214_v8, 2102212464 }
 0x351   : > { %v1234_v21 = vsel %vm1224_vm4, %v1220_v10, 1326507024  ;;  %v1231_v22 = vsel %vm1223_vm5, %v1214_v8, %v1230_v17  ;;  %v1225_v0 = vsel %vm1221_vm0, %v1205_v58, %v1208_v6  ;;  %v1227_v1 = vsel %vm1223_vm5, %v1211_v7, %v1226_v55 }
 0x352   : > { %v1235_v56 = vsel %vm1223_vm5, %v1217_v9, %v1234_v21  ;;  %v1232_v15 = vsel %vm1222_vm6, %v1229_v12, %v1231_v22  ;;  %v1228_v59 = vsel %vm1222_vm6, %v1225_v0, %v1227_v1 }
 0x353   : > { %v1236_v23 = vsel %vm1222_vm6, %v1233_v13, %v1235_v56  ;;  %v1262_v29 = vand.u32 65535, %v1232_v15  ;;  %v1263_v32 = vshrl.u32 %v1232_v15, 16  ;;  %v1282_v12 = vmul.u32 %v2535_v3, %v1228_v59 }
 0x354   : > { %v1240_v26 = vand.u32 65535, %v1236_v23  ;;  %v1241_v28 = vshrl.u32 %v1236_v23, 16  ;;  %vm1332_vm6 = vweird.f32 %v2512_v11 }
 0x355   : > { %v1265_v37 = vmul.u32 %v1263_v32, %v1238_v24  ;;  %v1266_v25 = vmul.u32 %v1262_v29, %v1239_v16  ;;  %v1264_v42 = vmul.u32 %v1262_v29, %v1238_v24  ;;  %v1267_v46 = vmul.u32 %v1263_v32, %v1239_v16 }
 0x356   : > { %v1243_v2 = vmul.u32 %v1241_v28, %v1238_v24  ;;  %v1244_v19 = vmul.u32 %v1240_v26, %v1239_v16  ;;  %v1242_v38 = vmul.u32 %v1240_v26, %v1238_v24  ;;  %v1245_v14 = vmul.u32 %v1241_v28, %v1239_v16 }
 0x357   : > { %v1268_v43 = vshll.u32 %v1265_v37, 16  ;;  %v1270_v34 = vshll.u32 %v1266_v25, 16  ;;  %v1269_v63 = vshrl.u32 %v1265_v37, 16  ;;  %v1271_v60 = vshrl.u32 %v1266_v25, 16 }
 0x358   : > { %v1246_v40 = vshll.u32 %v1243_v2, 16  ;;  %v1248_v45 = vshll.u32 %v1244_v19, 16  ;;  %v1247_v48 = vshrl.u32 %v1243_v2, 16  ;;  %v1249_v51 = vshrl.u32 %v1244_v19, 16 }
 0x359   : > { %vm1272_vm8 = vc.u32 %v1264_v42, %v1268_v43  ;;  %v1274_v53 = vadd.s32 %v1268_v43, %v1264_v42 }
 0x35a   : > { %vm1250_vm7 = vc.u32 %v1242_v38, %v1246_v40  ;;  %v1252_v27 = vadd.s32 %v1246_v40, %v1242_v38  ;;  %v1273_v18 = vsel %vm1272_vm8, 1, %v2108_v20 }
 0x35b   : > { %v1251_v49 = vsel %vm1250_vm7, 1, %v2108_v20  ;;  %v1275_v57 = vadd.s32 %v1273_v18, %v1267_v46  ;;  %vm1276_vm11 = vc.u32 %v1274_v53, %v1270_v34  ;;  %v1278_v8 = vadd.s32 %v1274_v53, %v1270_v34 }
 0x35c   : > { %v1253_v50 = vadd.s32 %v1251_v49, %v1245_v14  ;;  %vm1254_vm10 = vc.u32 %v1252_v27, %v1248_v45  ;;  %v1277_v30 = vsel %vm1276_vm11, 1, %v2108_v20 }
 0x35d   : > { %v1255_v47 = vsel %vm1254_vm10, 1, %v2108_v20  ;;  %v1279_v35 = vadd.s32 %v1277_v30, %v1275_v57 }
 0x35e   : > { %v1257_v61 = vadd.s32 %v1255_v47, %v1253_v50 }
 0x35f   : > { %v1280_v54 = vadd.s32 %v1279_v35, %v1269_v63 }
 0x360   : > { %v1258_v4 = vadd.s32 %v1257_v61, %v1247_v48 }
 0x361   : > { %v1281_v9 = vadd.s32 %v1280_v54, %v1271_v60 }
 0x362   : > { %v1259_v5 = vadd.s32 %v1258_v4, %v1249_v51 }
 0x363   : > { %v1285_v10 = vadd.s32 1, %v1281_v9 }
 0x364   : > { %vm1284_vm12 = vc.u32 %v1259_v5, %v1278_v8  ;;  %v1283_v62 = vadd.s32 %v1278_v8, %v1259_v5  ;;  %v2090_v8 = vld [vmem:[%s2890_s10] ss:$0 sm:$0xff] }
 0x365   : > { %v1286_v13 = vsel %vm1284_vm12, %v1285_v10, %v1281_v9 }
 0x366   : > { %v1287_v17 = vadd.s32 %v1286_v13, %v1282_v12 }
 0x368   : > { %v1288_v6 = vadd.s32 536870912, %v1287_v17 }
 0x36a   : > { %v1289_v21 = vshrl.u32 %v1288_v6, 30 }
 0x36c   : > { %v1290_v22 = vshll.u32 %v1289_v21, 30  ;;  %v1313_v43 = vsub.s32 4, %v1289_v21 }
 0x36e   : > { %v1291_v7 = vsub.s32 %v1287_v17, %v1290_v22  ;;  %v1314_v34 = vsel %vm1191_vm2, %v1313_v43, %v1289_v21 }
 0x36f   : > { %v1316_v18 = vsel %vm1190_vm3, 0, %v1314_v34 }
 0x370   : > { %vm1292_vm13 = vcmp.lt.s32.totalorder %v1291_v7, 0  ;;  %v1293_v56 = vsub.s32 0, %v1291_v7  ;;  %v1333_v48 = vadd.s32 3, %v1316_v18 }
 0x372   : > { %v1294_v15 = vsel %vm1292_vm13, %v1293_v56, %v1291_v7  ;;  %v1334_v35 = vand.u32 3, %v1333_v48 }
 0x373   : > { %v1295_v23 = vclz %v1294_v15 }
 0x374   : > { %vm1336_vm0 = vcmp.eq.s32.totalorder %v1334_v35, 0  ;;  %vm1339_vm4 = vcmp.eq.s32.totalorder %v1334_v35, 2  ;;  %vm1335_vm5 = vcmp.lt.s32.totalorder %v1334_v35, 2 }
 0x375   : > { %v2054_v24 = vadd.s32 4294967294, %v1295_v23 }
 0x377   : > { %vm2055_vm14 = vcmp.lt.s32.totalorder %v2054_v24, 0 }
 0x378   : > { %v1298_v16 = vsel %vm2055_vm14, 0, %v2054_v24 }
 0x379   : > { %v1299_v26 = vsub.s32 32, %v1298_v16  ;;  %v1303_v28 = vsub.s32 4294967266, %v1298_v16  ;;  %v1300_v29 = vshll.u32 %v1291_v7, %v1298_v16 }
 0x37b   : > { %v1301_v32 = vshrl.u32 %v1283_v62, %v1299_v26  ;;  %v1304_v2 = vadd.s32 127, %v1303_v28 }
 0x37d   : > { %v1302_v3 = vor.u32 %v1301_v32, %v1300_v29  ;;  %v1305_v19 = vshll.u32 %v1304_v2, 23 }
 0x37f   : > { %v1306_v37 = vor.u32 4788187, %v1305_v19  ;;  %v1309_v38 = vcvt.s32.f32 %v1302_v3 }
 0x381   : > { %v1307_v25 = vand.u32 2147483647, %v1306_v37 }
 0x383   : > { %v1310_v40 = vmul.f32 %v1309_v38, %v1307_v25 }
 0x385   : > { %v1311_v14 = vxor.u32 2147483648, %v1310_v40 }
 0x387   : > { %v1312_v42 = vsel %vm1191_vm2, %v1311_v14, %v1310_v40 }
 0x388   : > { %v1315_v45 = vsel %vm1190_vm3, %v2512_v11, %v1312_v42 }
 0x389   : > { %v1317_v27 = vmul.f32 %v1315_v45, %v1315_v45 }
 0x38b   : > { %v1318_v46 = vmul.f32 -0.001358992, %v1317_v27  ;;  %v1325_v49 = vmul.f32 -0.00019511016, %v1317_v27 }
 0x38d   : > { %v1319_v53 = vadd.f32 0.041655596, %v1318_v46  ;;  %v1326_v50 = vadd.f32 0.008332121, %v1325_v49 }
 0x38f   : > { %v1320_v55 = vmul.f32 %v1319_v53, %v1317_v27  ;;  %v1327_v47 = vmul.f32 %v1326_v50, %v1317_v27 }
 0x391   : > { %v1321_v57 = vadd.f32 -0.4999988, %v1320_v55  ;;  %v1328_v58 = vadd.f32 -0.16666654, %v1327_v47 }
 0x393   : > { %v1322_v61 = vmul.f32 %v1321_v57, %v1317_v27  ;;  %v1329_v30 = vmul.f32 %v1328_v58, %v1317_v27 }
 0x395   : > { %v1323_v52 = vadd.f32 1.0, %v1322_v61  ;;  %v1330_v63 = vadd.f32 1.0, %v1329_v30 }
 0x397   : > { %v1331_v0 = vmul.f32 %v1330_v63, %v1315_v45  ;;  %v1340_v1 = vxor.u32 2147483648, %v1323_v52 }
 0x399   : > { %v1337_v51 = vxor.u32 2147483648, %v1331_v0  ;;  %v1341_v60 = vsel %vm1339_vm4, %v1340_v1, %v1331_v0 }
 0x39b   : > { %v1338_v4 = vsel %vm1336_vm0, %v1323_v52, %v1337_v51 }
 0x39c   : > { %v1342_v54 = vsel %vm1335_vm5, %v1338_v4, %v1341_v60 }
 0x39d   : > { %v1343_v5 = vsel %vm1332_vm6, nan, %v1342_v54 }
 0x39e   : > { %1344 = vst.msk [vmem:[%s581_s26] sm:$0xff] %vm588_vm1, %v1343_v5  ;;  %2057 = vmatmul.msk.f32.vlgmr.msrb.gmra.mxu0 %vm588_vm1, %v1343_v5 }
 0x41b   : > { %v1373_v59 = vpop.f32.mrf.mxu0 }
 0x41c   : > { %v2586_v9 = vadd.f32 %v2090_v8, %v1373_v59 }
 0x41e   : > { %v1379_v10 = vand.u32 2139095040, %v2586_v9  ;;  %v1376_v17 = vand.u32 2147483647, %v2586_v9  ;;  %vm1378_vm6 = vcmp.lt.s32.totalorder %v2586_v9, 0 }
 0x420   : > { %v1380_v12 = vshrl.u32 %v1379_v10, 23  ;;  %v1383_v6 = vand.u32 8388607, %v1376_v17 }
 0x422   : > { %v2058_v13 = vadd.s32 4294967169, %v1380_v12  ;;  %v1384_v56 = vor.u32 8388608, %v1383_v6 }
 0x424   : > { %v1386_v11 = vadd.s32 1, %v2058_v13  ;;  %v2605_v14 = vshll.u32 %v1384_v56, 8 }
 0x426   : > { %vm1387_vm7 = vcmp.gt.s32.totalorder %v1386_v11, 0  ;;  %v1425_v50 = vand.u32 65535, %v2605_v14  ;;  %v1426_v18 = vshrl.u32 %v2605_v14, 16 }
 0x427   : > { %v1388_v21 = vsel %vm1387_vm7, %v1386_v11, 0  ;;  %vm1377_vm7 = vcmp.le.f32.partialorder %v1376_v17, 0.7853982 }
 0x428   : > { %v1390_v22 = vand.u32 31, %v1388_v21  ;;  %v2592_v15 = vshrl.u32 %v1388_v21, 5 }
 0x42a   : > { %v1391_v7 = vsub.s32 32, %v1390_v22  ;;  %v1393_v23 = vshll.u32 %v2105_v39, %v1390_v22  ;;  %v1396_v24 = vshll.u32 %v2106_v41, %v1390_v22  ;;  %v1399_v26 = vshll.u32 %v2107_v44, %v1390_v22 }
 0x42b   : > { %v1402_v29 = vshll.u32 %v2102_v31, %v1390_v22  ;;  %v1405_v2 = vshll.u32 %v2103_v33, %v1390_v22  ;;  %vm1408_vm8 = vcmp.lt.s32.totalorder %v2592_v15, 1  ;;  %vm1411_vm10 = vcmp.lt.s32.totalorder %v2592_v15, 4 }
 0x42c   : > { %v1394_v16 = vshrl.u32 %v2106_v41, %v1391_v7  ;;  %v1397_v62 = vshrl.u32 %v2107_v44, %v1391_v7  ;;  %v1400_v28 = vshrl.u32 %v2102_v31, %v1391_v7  ;;  %v1403_v32 = vshrl.u32 %v2103_v33, %v1391_v7 }
 0x42d   : > { %v1406_v3 = vshrl.u32 %v2104_v36, %v1391_v7  ;;  %vm1410_vm11 = vcmp.lt.s32.totalorder %v2592_v15, 3  ;;  %vm1409_vm12 = vcmp.lt.s32.totalorder %v2592_v15, 2  ;;  %v1392_v21 = vshrl.u32 %v2105_v39, %v1391_v7  ;;  %v1532_v15 = vld [vmem:[%s2891_s11 + $0x8] sm:$0xff] }
 0x42e   : > { %v1395_v19 = vor.u32 %v1394_v16, %v1393_v23  ;;  %v1398_v37 = vor.u32 %v1397_v62, %v1396_v24  ;;  %v1401_v25 = vor.u32 %v1400_v28, %v1399_v26  ;;  %v1404_v38 = vor.u32 %v1403_v32, %v1402_v29 }
 0x42f   : > { %v1407_v40 = vor.u32 %v1406_v3, %v1405_v2 }
 0x430   : > { %v1416_v42 = vsel %vm1408_vm8, %v1395_v19, %v1398_v37  ;;  %v1420_v43 = vsel %vm1408_vm8, %v1398_v37, %v1401_v25  ;;  %v1417_v45 = vsel %vm1411_vm10, %v1404_v38, 920167782  ;;  %v1413_v13 = vsel %vm1411_vm10, %v1401_v25, 2102212464 }
 0x431   : > { %v1421_v27 = vsel %vm1411_vm10, %v1407_v40, 1326507024  ;;  %v1418_v46 = vsel %vm1410_vm11, %v1401_v25, %v1417_v45  ;;  %v1412_v62 = vsel %vm1408_vm8, %v1392_v21, %v1395_v19  ;;  %v1414_v26 = vsel %vm1410_vm11, %v1398_v37, %v1413_v13  ;;  %v1534_v37 = vld [vmem:[%s2891_s11 + $0x18] sm:$0xff] }
 0x432   : > { %v1422_v49 = vsel %vm1410_vm11, %v1404_v38, %v1421_v27  ;;  %v1419_v34 = vsel %vm1409_vm12, %v1416_v42, %v1418_v46  ;;  %v1415_v7 = vsel %vm1409_vm12, %v1412_v62, %v1414_v26  ;;  %v1533_v27 = vld [vmem:[%s2891_s11 + $0x10] sm:$0xff]  ;;  %1554 = vmatpush.msra.mxu3 %v1534_v37 }
 0x433   : > { %v1423_v53 = vsel %vm1409_vm12, %v1420_v43, %v1422_v49  ;;  %v1449_v57 = vand.u32 65535, %v1419_v34  ;;  %v1450_v58 = vshrl.u32 %v1419_v34, 16  ;;  %v1469_v42 = vmul.u32 %v2605_v14, %v1415_v7  ;;  %v1531_v14 = vld [vmem:[%s2891_s11] sm:$0xff] }
 0x434   : > { %v1427_v55 = vand.u32 65535, %v1423_v53  ;;  %v1428_v47 = vshrl.u32 %v1423_v53, 16  ;;  %1555 = vmatpush.msra.mxu3 %v1533_v27  ;;  %vm1519_vm12 = vweird.f32 %v2586_v9 }
 0x435   : > { %v1452_v30 = vmul.u32 %v1450_v58, %v1425_v50  ;;  %v1453_v52 = vmul.u32 %v1449_v57, %v1426_v18  ;;  %v1451_v1 = vmul.u32 %v1449_v57, %v1425_v50  ;;  %v1454_v54 = vmul.u32 %v1450_v58, %v1426_v18 }
 0x436   : > { %v1430_v48 = vmul.u32 %v1428_v47, %v1425_v50  ;;  %v1431_v61 = vmul.u32 %v1427_v55, %v1426_v18  ;;  %v1429_v63 = vmul.u32 %v1427_v55, %v1425_v50  ;;  %v1432_v0 = vmul.u32 %v1428_v47, %v1426_v18  ;;  %1556 = vmatpush.msra.mxu3 %v1532_v15 }
 0x437   : > { %v1455_v51 = vshll.u32 %v1452_v30, 16  ;;  %v1457_v8 = vshll.u32 %v1453_v52, 16  ;;  %v1456_v24 = vshrl.u32 %v1452_v30, 16  ;;  %v1458_v32 = vshrl.u32 %v1453_v52, 16 }
 0x438   : > { %v1433_v35 = vshll.u32 %v1430_v48, 16  ;;  %v1435_v4 = vshll.u32 %v1431_v61, 16  ;;  %v1434_v22 = vshrl.u32 %v1430_v48, 16  ;;  %v1436_v28 = vshrl.u32 %v1431_v61, 16  ;;  %1557 = vmatpush.msra.mxu3 %v1531_v14 }
 0x439   : > { %vm1459_vm14 = vc.u32 %v1451_v1, %v1455_v51  ;;  %v1461_v59 = vadd.s32 %v1455_v51, %v1451_v1 }
 0x43a   : > { %vm1437_vm13 = vc.u32 %v1429_v63, %v1433_v35  ;;  %v1439_v60 = vadd.s32 %v1433_v35, %v1429_v63  ;;  %v1460_v12 = vsel %vm1459_vm14, 1, %v2108_v20 }
 0x43b   : > { %v1438_v5 = vsel %vm1437_vm13, 1, %v2108_v20  ;;  %v1462_v6 = vadd.s32 %v1460_v12, %v1454_v54  ;;  %vm1463_vm3 = vc.u32 %v1461_v59, %v1457_v8  ;;  %v1465_v25 = vadd.s32 %v1461_v59, %v1457_v8 }
 0x43c   : > { %v1440_v10 = vadd.s32 %v1438_v5, %v1432_v0  ;;  %vm1441_vm2 = vc.u32 %v1439_v60, %v1435_v4  ;;  %v1464_v23 = vsel %vm1463_vm3, 1, %v2108_v20 }
 0x43d   : > { %v1442_v11 = vsel %vm1441_vm2, 1, %v2108_v20  ;;  %v1466_v16 = vadd.s32 %v1464_v23, %v1462_v6 }
 0x43e   : > { %v1444_v56 = vadd.s32 %v1442_v11, %v1440_v10 }
 0x43f   : > { %v1467_v2 = vadd.s32 %v1466_v16, %v1456_v24 }
 0x440   : > { %v1445_v29 = vadd.s32 %v1444_v56, %v1434_v22 }
 0x441   : > { %v1468_v38 = vadd.s32 %v1467_v2, %v1458_v32 }
 0x442   : > { %v1446_v3 = vadd.s32 %v1445_v29, %v1436_v28 }
 0x443   : > { %v1472_v40 = vadd.s32 1, %v1468_v38 }
 0x444   : > { %vm1471_vm0 = vc.u32 %v1446_v3, %v1465_v25  ;;  %v1470_v57 = vadd.s32 %v1465_v25, %v1446_v3 }
 0x445   : > { %v1473_v43 = vsel %vm1471_vm0, %v1472_v40, %v1468_v38 }
 0x446   : > { %v1474_v45 = vadd.s32 %v1473_v43, %v1469_v42  ;;  %v2091_v42 = vld [vmem:[%s2892_s12] ss:$0 sm:$0xff] }
 0x448   : > { %v1475_v19 = vadd.s32 536870912, %v1474_v45 }
 0x44a   : > { %v1476_v46 = vshrl.u32 %v1475_v19, 30 }
 0x44c   : > { %v1477_v49 = vshll.u32 %v1476_v46, 30  ;;  %v1500_v8 = vsub.s32 4, %v1476_v46 }
 0x44e   : > { %v1478_v34 = vsub.s32 %v1474_v45, %v1477_v49  ;;  %v1501_v13 = vsel %vm1378_vm6, %v1500_v8, %v1476_v46 }
 0x44f   : > { %v1503_v21 = vsel %vm1377_vm7, 0, %v1501_v13 }
 0x450   : > { %vm1479_vm4 = vcmp.lt.s32.totalorder %v1478_v34, 0  ;;  %v1480_v53 = vsub.s32 0, %v1478_v34  ;;  %v1520_v16 = vadd.s32 3, %v1503_v21 }
 0x452   : > { %v1481_v50 = vsel %vm1479_vm4, %v1480_v53, %v1478_v34  ;;  %v1521_v29 = vand.u32 3, %v1520_v16 }
 0x453   : > { %v1482_v18 = vclz %v1481_v50 }
 0x454   : > { %vm1523_vm8 = vcmp.eq.s32.totalorder %v1521_v29, 0  ;;  %vm1526_vm10 = vcmp.eq.s32.totalorder %v1521_v29, 2  ;;  %vm1522_vm11 = vcmp.lt.s32.totalorder %v1521_v29, 2 }
 0x455   : > { %v2059_v55 = vadd.s32 4294967294, %v1482_v18 }
 0x457   : > { %vm2060_vm5 = vcmp.lt.s32.totalorder %v2059_v55, 0 }
 0x458   : > { %v1485_v47 = vsel %vm2060_vm5, 0, %v2059_v55 }
 0x459   : > { %v1486_v58 = vsub.s32 32, %v1485_v47  ;;  %v1490_v48 = vsub.s32 4294967266, %v1485_v47  ;;  %v1487_v61 = vshll.u32 %v1478_v34, %v1485_v47 }
 0x45b   : > { %v1488_v30 = vshrl.u32 %v1470_v57, %v1486_v58  ;;  %v1491_v52 = vadd.s32 127, %v1490_v48 }
 0x45d   : > { %v1489_v63 = vor.u32 %v1488_v30, %v1487_v61  ;;  %v1492_v35 = vshll.u32 %v1491_v52, 23 }
 0x45f   : > { %v1493_v0 = vor.u32 4788187, %v1492_v35  ;;  %v1496_v51 = vcvt.s32.f32 %v1489_v63 }
 0x461   : > { %v1494_v1 = vand.u32 2147483647, %v1493_v0 }
 0x463   : > { %v1497_v4 = vmul.f32 %v1496_v51, %v1494_v1 }
 0x465   : > { %v1498_v60 = vxor.u32 2147483648, %v1497_v4 }
 0x467   : > { %v1499_v54 = vsel %vm1378_vm6, %v1498_v60, %v1497_v4 }
 0x468   : > { %v1502_v5 = vsel %vm1377_vm7, %v2586_v9, %v1499_v54 }
 0x469   : > { %v1504_v59 = vmul.f32 %v1502_v5, %v1502_v5 }
 0x46b   : > { %v1505_v10 = vmul.f32 -0.001358992, %v1504_v59  ;;  %v1512_v12 = vmul.f32 -0.00019511016, %v1504_v59 }
 0x46d   : > { %v1506_v11 = vadd.f32 0.041655596, %v1505_v10  ;;  %v1513_v6 = vadd.f32 0.008332121, %v1512_v12 }
 0x46f   : > { %v1507_v22 = vmul.f32 %v1506_v11, %v1504_v59  ;;  %v1514_v56 = vmul.f32 %v1513_v6, %v1504_v59 }
 0x471   : > { %v1508_v23 = vadd.f32 -0.4999988, %v1507_v22  ;;  %v1515_v24 = vadd.f32 -0.16666654, %v1514_v56 }
 0x473   : > { %v1509_v62 = vmul.f32 %v1508_v23, %v1504_v59  ;;  %v1516_v26 = vmul.f32 %v1515_v24, %v1504_v59 }
 0x475   : > { %v1510_v28 = vadd.f32 1.0, %v1509_v62  ;;  %v1517_v17 = vadd.f32 1.0, %v1516_v26 }
 0x477   : > { %v1518_v32 = vmul.f32 %v1517_v17, %v1502_v5  ;;  %v1527_v2 = vxor.u32 2147483648, %v1510_v28 }
 0x479   : > { %v1524_v3 = vxor.u32 2147483648, %v1518_v32  ;;  %v1528_v7 = vsel %vm1526_vm10, %v1527_v2, %v1518_v32 }
 0x47b   : > { %v1525_v25 = vsel %vm1523_vm8, %v1510_v28, %v1524_v3 }
 0x47c   : > { %v1529_v38 = vsel %vm1522_vm11, %v1525_v25, %v1528_v7 }
 0x47d   : > { %v1530_v40 = vsel %vm1519_vm12, nan, %v1529_v38 }
 0x47e   : > { %2061 = vmatmul.msk.f32.vlgmr.msra.gmra.mxu3 %vm1165_vm15, %v1530_v40 }
 0x501   : > { %v1559_v43 = vpop.f32.mrf.mxu3 }
 0x502   : > { %v2663_v45 = vadd.f32 %v2091_v42, %v1559_v43 }
 0x504   : > { %v1565_v19 = vand.u32 2139095040, %v2663_v45  ;;  %v1562_v46 = vand.u32 2147483647, %v2663_v45  ;;  %vm1564_vm11 = vcmp.lt.s32.totalorder %v2663_v45, 0 }
 0x506   : > { %v1566_v37 = vshrl.u32 %v1565_v19, 23  ;;  %v1569_v9 = vand.u32 8388607, %v1562_v46  ;;  %vm1563_vm12 = vcmp.le.f32.partialorder %v1562_v46, 0.7853982 }
 0x508   : > { %v2062_v27 = vadd.s32 4294967169, %v1566_v37  ;;  %v1570_v53 = vor.u32 8388608, %v1569_v9 }
 0x50a   : > { %v1572_v15 = vadd.s32 1, %v2062_v27  ;;  %v2682_v60 = vshll.u32 %v1570_v53, 8 }
 0x50c   : > { %vm1573_vm13 = vcmp.gt.s32.totalorder %v1572_v15, 0  ;;  %v1611_v6 = vand.u32 65535, %v2682_v60  ;;  %v1612_v21 = vshrl.u32 %v2682_v60, 16 }
 0x50d   : > { %v1574_v49 = vsel %vm1573_vm13, %v1572_v15, 0 }
 0x50e   : > { %v1576_v14 = vand.u32 31, %v1574_v49  ;;  %v2669_v50 = vshrl.u32 %v1574_v49, 5 }
 0x510   : > { %v1577_v34 = vsub.s32 32, %v1576_v14  ;;  %v1579_v18 = vshll.u32 %v2105_v39, %v1576_v14  ;;  %v1582_v55 = vshll.u32 %v2106_v41, %v1576_v14  ;;  %v1585_v58 = vshll.u32 %v2107_v44, %v1576_v14 }
 0x511   : > { %v1588_v61 = vshll.u32 %v2102_v31, %v1576_v14  ;;  %v1591_v52 = vshll.u32 %v2103_v33, %v1576_v14  ;;  %vm1594_vm15 = vcmp.lt.s32.totalorder %v2669_v50, 1  ;;  %vm1597_vm14 = vcmp.lt.s32.totalorder %v2669_v50, 4 }
 0x512   : > { %v1580_v47 = vshrl.u32 %v2106_v41, %v1577_v34  ;;  %v1583_v57 = vshrl.u32 %v2107_v44, %v1577_v34  ;;  %v1586_v48 = vshrl.u32 %v2102_v31, %v1577_v34  ;;  %v1589_v30 = vshrl.u32 %v2103_v33, %v1577_v34 }
 0x513   : > { %v1592_v63 = vshrl.u32 %v2104_v36, %v1577_v34  ;;  %vm1596_vm2 = vcmp.lt.s32.totalorder %v2669_v50, 3  ;;  %vm1595_vm3 = vcmp.lt.s32.totalorder %v2669_v50, 2  ;;  %v1578_v49 = vshrl.u32 %v2105_v39, %v1577_v34  ;;  %v1722_v50 = vld [vmem:[%s2893_s13 + $0x28] sm:$0xff] }
 0x514   : > { %v1581_v35 = vor.u32 %v1580_v47, %v1579_v18  ;;  %v1584_v0 = vor.u32 %v1583_v57, %v1582_v55  ;;  %v1587_v1 = vor.u32 %v1586_v48, %v1585_v58  ;;  %v1590_v51 = vor.u32 %v1589_v30, %v1588_v61 }
 0x515   : > { %v1593_v4 = vor.u32 %v1592_v63, %v1591_v52 }
 0x516   : > { %v1602_v54 = vsel %vm1594_vm15, %v1581_v35, %v1584_v0  ;;  %v1606_v5 = vsel %vm1594_vm15, %v1584_v0, %v1587_v1  ;;  %v1603_v8 = vsel %vm1597_vm14, %v1590_v51, 920167782  ;;  %v1599_v27 = vsel %vm1597_vm14, %v1587_v1, 2102212464 }
 0x517   : > { %v1607_v59 = vsel %vm1597_vm14, %v1593_v4, 1326507024  ;;  %v1604_v10 = vsel %vm1596_vm2, %v1587_v1, %v1603_v8  ;;  %v1598_v57 = vsel %vm1594_vm15, %v1578_v49, %v1581_v35  ;;  %v1600_v58 = vsel %vm1596_vm2, %v1584_v0, %v1599_v27  ;;  %v1724_v0 = vld [vmem:[%s2893_s13 + $0x38] sm:$0xff] }
 0x518   : > { %v1608_v12 = vsel %vm1596_vm2, %v1590_v51, %v1607_v59  ;;  %v1605_v13 = vsel %vm1595_vm3, %v1602_v54, %v1604_v10  ;;  %v1601_v34 = vsel %vm1595_vm3, %v1598_v57, %v1600_v58  ;;  %v1723_v59 = vld [vmem:[%s2893_s13 + $0x30] sm:$0xff]  ;;  %1740 = vmatpush.msra.mxu0 %v1724_v0  ;;  %vm1705_vm2 = vweird.f32 %v2663_v45  ;;  %v1922_v0 = vld [vmem:[%s2895_s15 + $0x78] sm:$0xff] }
 0x519   : > { %v1609_v11 = vsel %vm1595_vm3, %v1606_v5, %v1608_v12  ;;  %v1635_v23 = vand.u32 65535, %v1605_v13  ;;  %v1636_v24 = vshrl.u32 %v1605_v13, 16  ;;  %v1655_v54 = vmul.u32 %v2682_v60, %v1601_v34  ;;  %v1721_v60 = vld [vmem:[%s2893_s13 + $0x20] sm:$0xff]  ;;  %1927 = vmatpush.msra.mxu2 %v1922_v0 }
 0x51a   : > { %v1613_v22 = vand.u32 65535, %v1609_v11  ;;  %v1614_v56 = vshrl.u32 %v1609_v11, 16  ;;  %1741 = vmatpush.msra.mxu0 %v1723_v59  ;;  %v1720_v11 = vld [vmem:[%s2893_s13 + $0x18] sm:$0xff]  ;;  %v1921_v59 = vld [vmem:[%s2895_s15 + $0x70] sm:$0xff] }
 0x51b   : > { %v1638_v26 = vmul.u32 %v1636_v24, %v1611_v6  ;;  %v1639_v28 = vmul.u32 %v1635_v23, %v1612_v21  ;;  %v1637_v2 = vmul.u32 %v1635_v23, %v1611_v6  ;;  %v1640_v38 = vmul.u32 %v1636_v24, %v1612_v21  ;;  %v1718_v23 = vld [vmem:[%s2893_s13 + $0x8] sm:$0xff]  ;;  %1928 = vmatpush.msra.mxu2 %v1921_v59 }
 0x51c   : > { %v1616_v16 = vmul.u32 %v1614_v56, %v1611_v6  ;;  %v1617_v62 = vmul.u32 %v1613_v22, %v1612_v21  ;;  %v1615_v17 = vmul.u32 %v1613_v22, %v1611_v6  ;;  %v1618_v32 = vmul.u32 %v1614_v56, %v1612_v21  ;;  %1742 = vmatpush.msra.mxu0 %v1722_v50  ;;  %v1719_v21 = vld [vmem:[%s2893_s13 + $0x10] sm:$0xff]  ;;  %v1918_v50 = vld [vmem:[%s2895_s15 + $0x58] sm:$0xff] }
 0x51d   : > { %v1641_v3 = vshll.u32 %v1638_v26, 16  ;;  %v1643_v42 = vshll.u32 %v1639_v28, 16  ;;  %v1642_v55 = vshrl.u32 %v1638_v26, 16  ;;  %v1644_v30 = vshrl.u32 %v1639_v28, 16 }
 0x51e   : > { %v1619_v29 = vshll.u32 %v1616_v16, 16  ;;  %v1621_v25 = vshll.u32 %v1617_v62, 16  ;;  %v1620_v14 = vshrl.u32 %v1616_v16, 16  ;;  %v1622_v48 = vshrl.u32 %v1617_v62, 16  ;;  %1743 = vmatpush.msra.mxu0 %v1721_v60  ;;  %v1717_v16 = vld [vmem:[%s2893_s13] sm:$0xff]  ;;  %v1917_v60 = vld [vmem:[%s2895_s15 + $0x50] sm:$0xff] }
 0x51f   : > { %vm1645_vm4 = vc.u32 %v1637_v2, %v1641_v3  ;;  %v1647_v43 = vadd.s32 %v1641_v3, %v1637_v2 }
 0x520   : > { %vm1623_vm0 = vc.u32 %v1615_v17, %v1619_v29  ;;  %v1625_v7 = vadd.s32 %v1619_v29, %v1615_v17  ;;  %v1646_v37 = vsel %vm1645_vm4, 1, %v2108_v20  ;;  %1744 = vmatpush.msra.mxu0 %v1720_v11 }
 0x521   : > { %v1624_v40 = vsel %vm1623_vm0, 1, %v2108_v20  ;;  %v1648_v9 = vadd.s32 %v1646_v37, %v1640_v38  ;;  %vm1649_vm6 = vc.u32 %v1647_v43, %v1643_v42  ;;  %v1651_v1 = vadd.s32 %v1647_v43, %v1643_v42 }
 0x522   : > { %v1626_v19 = vadd.s32 %v1624_v40, %v1618_v32  ;;  %vm1627_vm5 = vc.u32 %v1625_v7, %v1621_v25  ;;  %v1650_v18 = vsel %vm1649_vm6, 1, %v2108_v20  ;;  %1745 = vmatpush.msra.mxu0 %v1719_v21  ;;  %v1915_v21 = vld [vmem:[%s2895_s15 + $0x40] sm:$0xff] }
 0x523   : > { %v1628_v15 = vsel %vm1627_vm5, 1, %v2108_v20  ;;  %v1652_v47 = vadd.s32 %v1650_v18, %v1648_v9 }
 0x524   : > { %v1630_v53 = vadd.s32 %v1628_v15, %v1626_v19  ;;  %1746 = vmatpush.msra.mxu0 %v1718_v23 }
 0x525   : > { %v1653_v52 = vadd.s32 %v1652_v47, %v1642_v55 }
 0x526   : > { %v1631_v61 = vadd.s32 %v1630_v53, %v1620_v14  ;;  %1747 = vmatpush.msra.mxu0 %v1717_v16 }
 0x527   : > { %v1654_v51 = vadd.s32 %v1653_v52, %v1644_v30 }
 0x528   : > { %v1632_v63 = vadd.s32 %v1631_v61, %v1622_v48 }
 0x529   : > { %v1658_v4 = vadd.s32 1, %v1654_v51 }
 0x52a   : > { %vm1657_vm7 = vc.u32 %v1632_v63, %v1651_v1  ;;  %v1656_v26 = vadd.s32 %v1651_v1, %v1632_v63 }
 0x52b   : > { %v1659_v5 = vsel %vm1657_vm7, %v1658_v4, %v1654_v51 }
 0x52c   : > { %v1660_v8 = vadd.s32 %v1659_v5, %v1655_v54 }
 0x52e   : > { %v1661_v35 = vadd.s32 536870912, %v1660_v8 }
 0x530   : > { %v1662_v10 = vshrl.u32 %v1661_v35, 30 }
 0x532   : > { %v1663_v12 = vshll.u32 %v1662_v10, 30  ;;  %v1686_v27 = vsub.s32 4, %v1662_v10 }
 0x534   : > { %v1664_v13 = vsub.s32 %v1660_v8, %v1663_v12  ;;  %v1687_v14 = vsel %vm1564_vm11, %v1686_v27, %v1662_v10  ;;  %v1920_v10 = vld [vmem:[%s2895_s15 + $0x68] sm:$0xff]  ;;  %v2092_v12 = vld [vmem:[%s2894_s14] ss:$0 sm:$0xff] }
 0x535   : > { %v1689_v55 = vsel %vm1563_vm12, 0, %v1687_v14  ;;  %1929 = vmatpush.msra.mxu2 %v1920_v10 }
 0x536   : > { %vm1665_vm8 = vcmp.lt.s32.totalorder %v1664_v13, 0  ;;  %v1666_v6 = vsub.s32 0, %v1664_v13  ;;  %v1706_v61 = vadd.s32 3, %v1689_v55 }
 0x538   : > { %v1667_v22 = vsel %vm1665_vm8, %v1666_v6, %v1664_v13  ;;  %v1707_v1 = vand.u32 3, %v1706_v61 }
 0x539   : > { %v1668_v56 = vclz %v1667_v22 }
 0x53a   : > { %vm1709_vm13 = vcmp.eq.s32.totalorder %v1707_v1, 0  ;;  %vm1712_vm15 = vcmp.eq.s32.totalorder %v1707_v1, 2  ;;  %vm1708_vm14 = vcmp.lt.s32.totalorder %v1707_v1, 2 }
 0x53b   : > { %v2063_v24 = vadd.s32 4294967294, %v1668_v56  ;;  %v1914_v56 = vld [vmem:[%s2895_s15 + $0x38] sm:$0xff] }
 0x53d   : > { %vm2064_vm10 = vcmp.lt.s32.totalorder %v2063_v24, 0 }
 0x53e   : > { %v1671_v62 = vsel %vm2064_vm10, 0, %v2063_v24  ;;  %v1913_v24 = vld [vmem:[%s2895_s15 + $0x30] sm:$0xff] }
 0x53f   : > { %v1672_v28 = vsub.s32 32, %v1671_v62  ;;  %v1676_v17 = vsub.s32 4294967266, %v1671_v62  ;;  %v1673_v29 = vshll.u32 %v1664_v13, %v1671_v62  ;;  %v1916_v13 = vld [vmem:[%s2895_s15 + $0x48] sm:$0xff] }
 0x540   : > { %v1912_v62 = vld [vmem:[%s2895_s15 + $0x28] sm:$0xff] }
 0x541   : > { %v1674_v32 = vshrl.u32 %v1656_v26, %v1672_v28  ;;  %v1677_v2 = vadd.s32 127, %v1676_v17  ;;  %v1911_v17 = vld [vmem:[%s2895_s15 + $0x20] sm:$0xff] }
 0x543   : > { %v1675_v3 = vor.u32 %v1674_v32, %v1673_v29  ;;  %v1678_v25 = vshll.u32 %v1677_v2, 23  ;;  %v1910_v29 = vld [vmem:[%s2895_s15 + $0x18] sm:$0xff] }
 0x545   : > { %v1679_v7 = vor.u32 4788187, %v1678_v25  ;;  %v1682_v40 = vcvt.s32.f32 %v1675_v3  ;;  %v1909_v25 = vld [vmem:[%s2895_s15 + $0x10] sm:$0xff] }
 0x547   : > { %v1680_v38 = vand.u32 2147483647, %v1679_v7 }
 0x549   : > { %v1683_v42 = vmul.f32 %v1682_v40, %v1680_v38  ;;  %v1908_v38 = vld [vmem:[%s2895_s15 + $0x8] sm:$0xff] }
 0x54b   : > { %v1684_v43 = vxor.u32 2147483648, %v1683_v42 }
 0x54d   : > { %v1685_v19 = vsel %vm1564_vm11, %v1684_v43, %v1683_v42 }
 0x54e   : > { %v1688_v37 = vsel %vm1563_vm12, %v2663_v45, %v1685_v19  ;;  %v1919_v45 = vld [vmem:[%s2895_s15 + $0x60] sm:$0xff] }
 0x54f   : > { %v1690_v15 = vmul.f32 %v1688_v37, %v1688_v37  ;;  %1930 = vmatpush.msra.mxu2 %v1919_v45 }
 0x551   : > { %v1691_v9 = vmul.f32 -0.001358992, %v1690_v15  ;;  %v1698_v49 = vmul.f32 -0.00019511016, %v1690_v15  ;;  %1931 = vmatpush.msra.mxu2 %v1918_v50 }
 0x553   : > { %v1692_v53 = vadd.f32 0.041655596, %v1691_v9  ;;  %v1699_v18 = vadd.f32 0.008332121, %v1698_v49  ;;  %1932 = vmatpush.msra.mxu2 %v1917_v60 }
 0x555   : > { %v1693_v47 = vmul.f32 %v1692_v53, %v1690_v15  ;;  %v1700_v57 = vmul.f32 %v1699_v18, %v1690_v15  ;;  %1933 = vmatpush.msra.mxu2 %v1916_v13 }
 0x557   : > { %v1694_v58 = vadd.f32 -0.4999988, %v1693_v47  ;;  %v1701_v48 = vadd.f32 -0.16666654, %v1700_v57  ;;  %1934 = vmatpush.msra.mxu2 %v1915_v21 }
 0x559   : > { %v1695_v30 = vmul.f32 %v1694_v58, %v1690_v15  ;;  %v1702_v52 = vmul.f32 %v1701_v48, %v1690_v15  ;;  %1935 = vmatpush.msra.mxu2 %v1914_v56  ;;  %v1907_v15 = vld [vmem:[%s2895_s15] sm:$0xff] }
 0x55b   : > { %v1696_v63 = vadd.f32 1.0, %v1695_v30  ;;  %v1703_v46 = vadd.f32 1.0, %v1702_v52  ;;  %1936 = vmatpush.msra.mxu2 %v1913_v24 }
 0x55d   : > { %v1704_v34 = vmul.f32 %v1703_v46, %v1688_v37  ;;  %v1713_v51 = vxor.u32 2147483648, %v1696_v63  ;;  %1937 = vmatpush.msra.mxu2 %v1912_v62 }
 0x55f   : > { %v1710_v4 = vxor.u32 2147483648, %v1704_v34  ;;  %v1714_v5 = vsel %vm1712_vm15, %v1713_v51, %v1704_v34  ;;  %1938 = vmatpush.msra.mxu2 %v1911_v17 }
 0x561   : > { %v1711_v54 = vsel %vm1709_vm13, %v1696_v63, %v1710_v4  ;;  %1939 = vmatpush.msra.mxu2 %v1910_v29 }
 0x562   : > { %v1715_v8 = vsel %vm1708_vm14, %v1711_v54, %v1714_v5 }
 0x563   : > { %v1716_v35 = vsel %vm1705_vm2, nan, %v1715_v8  ;;  %1940 = vmatpush.msra.mxu2 %v1909_v25 }
 0x564   : > { %2065 = vmatmul.msk.f32.vlgmr.msra.gmra.mxu0 %vm978_vm9, %v1716_v35 }
 0x565   : > { %1941 = vmatpush.msra.mxu2 %v1908_v38 }
 0x567   : > { %1942 = vmatpush.msra.mxu2 %v1907_v15 }
 0x5e1   : > { %v1749_v11 = vpop.f32.mrf.mxu0 }
 0x5e2   : > { %v2773_v6 = vadd.f32 %v2092_v12, %v1749_v11 }
 0x5e4   : > { %v1755_v22 = vand.u32 2139095040, %v2773_v6  ;;  %v1752_v26 = vand.u32 2147483647, %v2773_v6  ;;  %vm1754_vm15 = vcmp.lt.s32.totalorder %v2773_v6, 0 }
 0x5e6   : > { %v1756_v23 = vshrl.u32 %v1755_v22, 23  ;;  %v1759_v32 = vand.u32 8388607, %v1752_v26  ;;  %vm1753_vm14 = vcmp.le.f32.partialorder %v1752_v26, 0.7853982 }
 0x5e8   : > { %v2066_v16 = vadd.s32 4294967169, %v1756_v23  ;;  %v1760_v40 = vor.u32 8388608, %v1759_v32 }
 0x5ea   : > { %v1762_v28 = vadd.s32 1, %v2066_v16  ;;  %v2825_v57 = vshll.u32 %v1760_v40, 8 }
 0x5ec   : > { %vm1763_vm9 = vcmp.gt.s32.totalorder %v1762_v28, 0  ;;  %v1801_v46 = vand.u32 65535, %v2825_v57  ;;  %v1802_v34 = vshrl.u32 %v2825_v57, 16 }
 0x5ed   : > { %v1764_v2 = vsel %vm1763_vm9, %v1762_v28, 0 }
 0x5ee   : > { %v1766_v3 = vand.u32 31, %v1764_v2  ;;  %v2805_v42 = vshrl.u32 %v1764_v2, 5 }
 0x5f0   : > { %v2800_v7 = vsub.s32 32, %v1766_v3  ;;  %v1778_v43 = vshll.u32 %v2102_v31, %v1766_v3  ;;  %v1781_v19 = vshll.u32 %v2103_v33, %v1766_v3  ;;  %v1769_v9 = vshll.u32 %v2105_v39, %v1766_v3 }
 0x5f1   : > { %v1772_v14 = vshll.u32 %v2106_v41, %v1766_v3  ;;  %vm1787_vm3 = vcmp.lt.s32.totalorder %v2805_v42, 4  ;;  %vm1784_vm0 = vcmp.lt.s32.totalorder %v2805_v42, 1  ;;  %vm1786_vm4 = vcmp.lt.s32.totalorder %v2805_v42, 3 }
 0x5f2   : > { %v1779_v37 = vshrl.u32 %v2103_v33, %v2800_v7  ;;  %v1782_v27 = vshrl.u32 %v2104_v36, %v2800_v7  ;;  %v1770_v49 = vshrl.u32 %v2106_v41, %v2800_v7  ;;  %v1773_v53 = vshrl.u32 %v2107_v44, %v2800_v7 }
 0x5f3   : > { %v1775_v33 = vshll.u32 %v2107_v44, %v1766_v3  ;;  %v1776_v36 = vshrl.u32 %v2102_v31, %v2800_v7  ;;  %vm1785_vm5 = vcmp.lt.s32.totalorder %v2805_v42, 2  ;;  %v1768_v28 = vshrl.u32 %v2105_v39, %v2800_v7 }
 0x5f4   : > { %v1780_v18 = vor.u32 %v1779_v37, %v1778_v43  ;;  %v1783_v55 = vor.u32 %v1782_v27, %v1781_v19  ;;  %v1771_v47 = vor.u32 %v1770_v49, %v1769_v9  ;;  %v1774_v58 = vor.u32 %v1773_v53, %v1772_v14 }
 0x5f5   : > { %v1777_v48 = vor.u32 %v1776_v36, %v1775_v33 }
 0x5f6   : > { %v1793_v41 = vsel %vm1787_vm3, %v1780_v18, 920167782  ;;  %v1797_v61 = vsel %vm1787_vm3, %v1783_v55, 1326507024  ;;  %v1792_v31 = vsel %vm1784_vm0, %v1771_v47, %v1774_v58  ;;  %v1788_v25 = vsel %vm1784_vm0, %v1768_v28, %v1771_v47 }
 0x5f7   : > { %v1794_v44 = vsel %vm1786_vm4, %v1777_v48, %v1793_v41  ;;  %v1796_v30 = vsel %vm1784_vm0, %v1774_v58, %v1777_v48  ;;  %v1798_v63 = vsel %vm1786_vm4, %v1780_v18, %v1797_v61  ;;  %v1789_v24 = vsel %vm1787_vm3, %v1777_v48, 2102212464 }
 0x5f8   : > { %v1795_v52 = vsel %vm1785_vm5, %v1792_v31, %v1794_v44  ;;  %v1799_v1 = vsel %vm1785_vm5, %v1796_v30, %v1798_v63  ;;  %v1790_v38 = vsel %vm1786_vm4, %v1774_v58, %v1789_v24  ;;  %vm1895_vm0 = vweird.f32 %v2773_v6 }
 0x5f9   : > { %v1825_v51 = vand.u32 65535, %v1795_v52  ;;  %v1826_v4 = vshrl.u32 %v1795_v52, 16  ;;  %v1803_v54 = vand.u32 65535, %v1799_v1  ;;  %v1804_v5 = vshrl.u32 %v1799_v1, 16 }
 0x5fa   : > { %v1791_v7 = vsel %vm1785_vm5, %v1788_v25, %v1790_v38 }
 0x5fb   : > { %v1828_v8 = vmul.u32 %v1826_v4, %v1801_v46  ;;  %v1829_v35 = vmul.u32 %v1825_v51, %v1802_v34  ;;  %v1806_v0 = vmul.u32 %v1804_v5, %v1801_v46  ;;  %v1807_v59 = vmul.u32 %v1803_v54, %v1802_v34 }
 0x5fc   : > { %v1827_v10 = vmul.u32 %v1825_v51, %v1801_v46  ;;  %v1805_v50 = vmul.u32 %v1803_v54, %v1801_v46  ;;  %v1830_v60 = vmul.u32 %v1826_v4, %v1802_v34  ;;  %v1808_v13 = vmul.u32 %v1804_v5, %v1802_v34 }
 0x5fd   : > { %v1831_v45 = vshll.u32 %v1828_v8, 16  ;;  %v1809_v12 = vshll.u32 %v1806_v0, 16  ;;  %v1833_v11 = vshll.u32 %v1829_v35, 16  ;;  %v1811_v22 = vshll.u32 %v1807_v59, 16 }
 0x5fe   : > { %v1832_v2 = vshrl.u32 %v1828_v8, 16  ;;  %v1810_v40 = vshrl.u32 %v1806_v0, 16  ;;  %v1834_v19 = vshrl.u32 %v1829_v35, 16  ;;  %v1812_v27 = vshrl.u32 %v1807_v59, 16 }
 0x5ff   : > { %vm1835_vm6 = vc.u32 %v1827_v10, %v1831_v45  ;;  %v1837_v21 = vadd.s32 %v1831_v45, %v1827_v10  ;;  %vm1813_vm7 = vc.u32 %v1805_v50, %v1809_v12  ;;  %v1815_v56 = vadd.s32 %v1809_v12, %v1805_v50 }
 0x600   : > { %v1836_v23 = vsel %vm1835_vm6, 1, %v2108_v20  ;;  %v1814_v16 = vsel %vm1813_vm7, 1, %v2108_v20  ;;  %v1845_v14 = vmul.u32 %v2825_v57, %v1791_v7 }
 0x601   : > { %v1838_v62 = vadd.s32 %v1836_v23, %v1830_v60  ;;  %vm1839_vm8 = vc.u32 %v1837_v21, %v1833_v11  ;;  %v1816_v17 = vadd.s32 %v1814_v16, %v1808_v13  ;;  %vm1817_vm10 = vc.u32 %v1815_v56, %v1811_v22 }
 0x602   : > { %v1840_v29 = vsel %vm1839_vm8, 1, %v2108_v20  ;;  %v1818_v32 = vsel %vm1817_vm10, 1, %v2108_v20  ;;  %v1841_v20 = vadd.s32 %v1837_v21, %v1833_v11 }
 0x603   : > { %v1842_v3 = vadd.s32 %v1840_v29, %v1838_v62  ;;  %v1820_v43 = vadd.s32 %v1818_v32, %v1816_v17 }
 0x605   : > { %v1843_v37 = vadd.s32 %v1842_v3, %v1832_v2  ;;  %v1821_v39 = vadd.s32 %v1820_v43, %v1810_v40  ;;  %v2093_v40 = vld [vmem:[%s2896_s16] ss:$0 sm:$0xff] }
 0x607   : > { %v1844_v15 = vadd.s32 %v1843_v37, %v1834_v19  ;;  %v1822_v9 = vadd.s32 %v1821_v39, %v1812_v27 }
 0x609   : > { %v1848_v49 = vadd.s32 1, %v1844_v15  ;;  %vm1847_vm11 = vc.u32 %v1822_v9, %v1841_v20  ;;  %v1846_v31 = vadd.s32 %v1841_v20, %v1822_v9 }
 0x60b   : > { %v1849_v53 = vsel %vm1847_vm11, %v1848_v49, %v1844_v15 }
 0x60c   : > { %v1850_v33 = vadd.s32 %v1849_v53, %v1845_v14 }
 0x60e   : > { %v1851_v36 = vadd.s32 536870912, %v1850_v33 }
 0x610   : > { %v1852_v18 = vshrl.u32 %v1851_v36, 30 }
 0x612   : > { %v1853_v55 = vshll.u32 %v1852_v18, 30  ;;  %v1876_v35 = vsub.s32 4, %v1852_v18 }
 0x614   : > { %v1854_v47 = vsub.s32 %v1850_v33, %v1853_v55  ;;  %v1877_v50 = vsel %vm1754_vm15, %v1876_v35, %v1852_v18 }
 0x615   : > { %v1879_v13 = vsel %vm1753_vm14, 0, %v1877_v50 }
 0x616   : > { %vm1855_vm12 = vcmp.lt.s32.totalorder %v1854_v47, 0  ;;  %v1856_v58 = vsub.s32 0, %v1854_v47  ;;  %v1896_v23 = vadd.s32 3, %v1879_v13 }
 0x618   : > { %v1857_v48 = vsel %vm1855_vm12, %v1856_v58, %v1854_v47  ;;  %v1897_v28 = vand.u32 3, %v1896_v23 }
 0x619   : > { %v1858_v41 = vclz %v1857_v48 }
 0x61a   : > { %vm1899_vm2 = vcmp.eq.s32.totalorder %v1897_v28, 0  ;;  %vm1902_vm9 = vcmp.eq.s32.totalorder %v1897_v28, 2  ;;  %vm1898_vm3 = vcmp.lt.s32.totalorder %v1897_v28, 2 }
 0x61b   : > { %v2067_v61 = vadd.s32 4294967294, %v1858_v41 }
 0x61d   : > { %vm2068_vm13 = vcmp.lt.s32.totalorder %v2067_v61, 0 }
 0x61e   : > { %v1861_v42 = vsel %vm2068_vm13, 0, %v2067_v61 }
 0x61f   : > { %v1862_v44 = vsub.s32 32, %v1861_v42  ;;  %v1866_v30 = vsub.s32 4294967266, %v1861_v42  ;;  %v1863_v52 = vshll.u32 %v1854_v47, %v1861_v42 }
 0x621   : > { %v1864_v63 = vshrl.u32 %v1846_v31, %v1862_v44  ;;  %v1867_v57 = vadd.s32 127, %v1866_v30 }
 0x623   : > { %v1865_v46 = vor.u32 %v1864_v63, %v1863_v52  ;;  %v1868_v1 = vshll.u32 %v1867_v57, 23 }
 0x625   : > { %v1869_v34 = vor.u32 4788187, %v1868_v1  ;;  %v1872_v4 = vcvt.s32.f32 %v1865_v46 }
 0x627   : > { %v1870_v51 = vand.u32 2147483647, %v1869_v34 }
 0x629   : > { %v1873_v54 = vmul.f32 %v1872_v4, %v1870_v51 }
 0x62b   : > { %v1874_v5 = vxor.u32 2147483648, %v1873_v54 }
 0x62d   : > { %v1875_v8 = vsel %vm1754_vm15, %v1874_v5, %v1873_v54 }
 0x62e   : > { %v1878_v0 = vsel %vm1753_vm14, %v2773_v6, %v1875_v8 }
 0x62f   : > { %v1880_v59 = vmul.f32 %v1878_v0, %v1878_v0 }
 0x631   : > { %v1881_v10 = vmul.f32 -0.001358992, %v1880_v59  ;;  %v1888_v45 = vmul.f32 -0.00019511016, %v1880_v59 }
 0x633   : > { %v1882_v12 = vadd.f32 0.041655596, %v1881_v10  ;;  %v1889_v60 = vadd.f32 0.008332121, %v1888_v45 }
 0x635   : > { %v1883_v11 = vmul.f32 %v1882_v12, %v1880_v59  ;;  %v1890_v21 = vmul.f32 %v1889_v60, %v1880_v59 }
 0x637   : > { %v1884_v22 = vadd.f32 -0.4999988, %v1883_v11  ;;  %v1891_v56 = vadd.f32 -0.16666654, %v1890_v21 }
 0x639   : > { %v1885_v24 = vmul.f32 %v1884_v22, %v1880_v59  ;;  %v1892_v16 = vmul.f32 %v1891_v56, %v1880_v59 }
 0x63b   : > { %v1886_v62 = vadd.f32 1.0, %v1885_v24  ;;  %v1893_v26 = vadd.f32 1.0, %v1892_v16 }
 0x63d   : > { %v1894_v17 = vmul.f32 %v1893_v26, %v1878_v0  ;;  %v1903_v29 = vxor.u32 2147483648, %v1886_v62 }
 0x63f   : > { %v1900_v32 = vxor.u32 2147483648, %v1894_v17  ;;  %v1904_v3 = vsel %vm1902_vm9, %v1903_v29, %v1894_v17 }
 0x641   : > { %v1901_v2 = vsel %vm1899_vm2, %v1886_v62, %v1900_v32 }
 0x642   : > { %v1905_v25 = vsel %vm1898_vm3, %v1901_v2, %v1904_v3 }
 0x643   : > { %v1906_v38 = vsel %vm1895_vm0, nan, %v1905_v25 }
 0x644   : > { %1943 = vmatmul.f32.vlgmr.msra.gmra.mxu2 %v1906_v38 }
 0x6c7   : > { %v1944_v43 = vpop.f32.mrf.mxu2 }
 0x6c8   : > { %v1945_v19 = vadd.f32 %v2093_v40, %v1944_v43 }
 0x6ca   : > { %1947 = vst.msk [vmem:[%s577_s29] sm:$0xff] %vm588_vm1, %v1945_v19 }
 0x6cb PF: > { %s29_s27 = sadd.s32 1, %s2100_s27  }
 0x6cc   : > { %p26_p4 = scmp.ge.s32.totalorder %s29_s27, 4  }
 0x6ce   :  { %28 = sbr.rel (!%p26_p4) target bundleno = 4 (0x4), region = 130 }

</bundles_post_ra>
